<compile_context>
chip_gen: v7x
topology: tpu7x:2x2x1
jax: 0.10.0
libtpu: 0.0.40
codegen_flags: <defaults>
</compile_context>

<pallas_src>
import functools

import jax
import jax.numpy as jnp
import numpy as np
from jax.experimental import pallas as pl
from jax.experimental.pallas import tpu as pltpu

# Module constants (from the PyTorch source).
CONV_FILTERS = [[1, 32], [3, 32], [3, 64], [5, 128]]
EMB = 256                                                # embedding_size
OUT = 256                                                # output_dim
NUM_FILTERS = sum(f[1] for f in CONV_FILTERS)            # 256
MAX_PAD = max((k - 1) // 2 for k, _ in CONV_FILTERS)     # 2
N_SHIFTS = 2 * MAX_PAD + 1                               # 5
HALO = 16                                                # bf16 sublane tile; >= 2*MAX_PAD
K5_COL0 = sum(oc for k, oc in CONV_FILTERS if k < 5)     # 128: first k=5 output column
K5_COLS = NUM_FILTERS - K5_COL0                          # 128


def _round_up(x, m):
    return ((x + m - 1) // m) * m


def longconv_kernel(body_ref, halo_ref, wmid_ref, wout_ref, bcat_ref, pw_ref,
                    pb_ref, o_ref, xw_ref, *, rb):
    """One TM-row tile of the flattened (batch * padded_seq) row axis.

    body_ref : (TM, E)       bf16  rows [j*TM, j*TM+TM) of globally padded input
    halo_ref : (HALO, E)     bf16  rows [(j+1)*TM, (j+1)*TM+HALO)
    wmid     : (3, E, NF)    bf16  combined conv weights for shifts -1, 0, +1
    wout     : (2, E, 128)   bf16  k=5-conv weights for shifts -2, +2
    bcat     : (1, NF)       f32   concatenated conv bias
    pw       : (NF, OUT)     bf16  projection weight (transposed)
    pb       : (1, OUT)      f32   projection bias
    o_ref    : (TM, OUT)           output tile
    xw_ref   : (rb+HALO, E)  bf16  scratch for the last sub-block's window
    """
    tm = body_ref.shape[0]
    n_sub = tm // rb

    # Hoist the small bias loads out of the sub-block loop.
    b_lo = bcat_ref[:, :K5_COL0]
    b_hi = bcat_ref[:, K5_COL0:]
    pb = pb_ref[...]

    def sub_block(load, base):
        # load(s) -> (rb, E) bf16 rows [base+s, base+s+rb) of the global window.
        # Shifted slices (s=1..4) are sublane-misaligned bf16 views; any
        # relayout copies hide under the ~6 MXU matmuls per sub-block at
        # TM>=512 (pltpu.roll onto the XLU is the fallback if a bundle dump
        # shows them exposed).  Chained dots keep the f32 accumulators in
        # vregs / the MXU result buffer -- no VMEM read-modify-write.
        mid = (jnp.dot(load(1), wmid_ref[0], preferred_element_type=jnp.float32)
               + jnp.dot(load(2), wmid_ref[1], preferred_element_type=jnp.float32)
               + jnp.dot(load(3), wmid_ref[2], preferred_element_type=jnp.float32))
        # Only the k=5 conv (columns 128:256) has taps at shift +/-2.
        outer = (jnp.dot(load(0), wout_ref[0], preferred_element_type=jnp.float32)
                 + jnp.dot(load(4), wout_ref[1], preferred_element_type=jnp.float32))
        lo = mid[:, :K5_COL0] + b_lo
        hi = mid[:, K5_COL0:] + b_hi + outer
        h = jnp.concatenate(
            [jnp.maximum(lo, 0.0), jnp.maximum(hi, 0.0)], axis=-1
        ).astype(jnp.bfloat16)
        y = jnp.dot(h, pw_ref[...], preferred_element_type=jnp.float32) + pb
        o_ref[pl.ds(base, rb), :] = y.astype(o_ref.dtype)

    # Sub-blocks whose shifted windows stay fully inside the body tile read
    # straight from the BlockSpec'd input buffer (no staging copy).
    if n_sub > 1:
        @pl.loop(0, n_sub - 1)
        def _(i):
            base = pl.multiple_of(i * rb, 16)
            sub_block(lambda s: body_ref[pl.ds(base + s, rb), :], base)

    # Last sub-block: its +1..+4 shifted rows spill past the body tile, so
    # stitch the last rb rows of the body with the 16-row halo block into a
    # small contiguous scratch (the only remaining vreg copy, rb+16 rows).
    xw_ref[0:rb, :] = body_ref[tm - rb:tm, :]
    xw_ref[rb:rb + HALO, :] = halo_ref[...]
    sub_block(lambda s: xw_ref[pl.ds(s, rb), :], tm - rb)


def _build_weights(conv_ws, conv_bs, proj_w, proj_b):
    """Shift-grouped conv weights.

    wmid[i] (E, NUM_FILTERS): for shift d in (-1, 0, +1), every conv's tap
    (d + pad_c) slice concatenated along output channels (zeros if no tap).
    wout[i] (E, 128): for shift d in (-2, +2), only the k=5 conv has a tap.
    """
    mids = []
    for d in (-1, 0, 1):
        cols = []
        for w, (k, oc) in zip(conv_ws, CONV_FILTERS):
            pad = (k - 1) // 2
            t = d + pad
            if 0 <= t < k:
                cols.append(jnp.transpose(w[:, :, t]))          # (E, oc)
            else:
                cols.append(jnp.zeros((EMB, oc), w.dtype))
        mids.append(jnp.concatenate(cols, axis=1))              # (E, NUM_FILTERS)
    wmid = jnp.stack(mids, axis=0).astype(jnp.bfloat16)         # (3, E, NF)

    w5 = conv_ws[-1]                                            # (128, E, 5) k=5 conv
    wout = jnp.stack([jnp.transpose(w5[:, :, 0]),               # d = -2  -> tap 0
                      jnp.transpose(w5[:, :, 4])],              # d = +2  -> tap 4
                     axis=0).astype(jnp.bfloat16)               # (2, E, 128)

    bcat = jnp.concatenate(conv_bs).reshape(1, NUM_FILTERS).astype(jnp.float32)
    pw = jnp.transpose(proj_w).astype(jnp.bfloat16)             # (NF, OUT)
    pb = proj_b.reshape(1, OUT).astype(jnp.float32)
    return wmid, wout, bcat, pw, pb


def long_conv_embedding(tokens, embed_table, conv_ws, conv_bs, proj_w, proj_b,
                        *, tile_m=1024, out_dtype=jnp.float32):
    """tokens: (B, L) int32. Returns (B, L, OUT) in out_dtype."""
    B, L = tokens.shape
    E = embed_table.shape[1]
    Lp = L + 2 * MAX_PAD
    R = B * Lp                                    # flattened padded row count

    # Embedding lookup (gather) + padding stay as plain-JAX glue (XLA fuses
    # the two pads into one pass over the gather output).
    # TODO(synk): fuse the gather/pad into the kernel (scalar-prefetch padded
    # token ids, row-gather embed_table rows straight into VMEM) to drop the
    # remaining HBM round trip over the activations.
    x = embed_table[tokens].astype(jnp.bfloat16)                   # (B, L, E)

    # Tile-size selection: big tiles amortize per-step overhead; keep >= 2
    # tiles when possible so both v7x TensorCores get work; TM multiple of 16
    # (bf16 sublane tiling).
    tile_m = max(16, _round_up(tile_m, 16))
    if R >= 2 * tile_m:
        TM = tile_m
    else:
        TM = max(16, _round_up(pl.cdiv(R, 2), 16))
    nM = pl.cdiv(R, TM)
    Rpad = nM * TM

    # One flat, globally padded row axis: xg[r + MAX_PAD] == padded(x)[r].
    xp = jnp.pad(x, ((0, 0), (MAX_PAD, MAX_PAD), (0, 0)))          # (B, Lp, E)
    xg = jnp.pad(xp.reshape(R, E),
                 ((MAX_PAD, Rpad + HALO - MAX_PAD - R), (0, 0)))   # (Rpad+HALO, E)

    wmid, wout, bcat, pw, pb = _build_weights(conv_ws, conv_bs, proj_w, proj_b)

    # Row sub-block held in vregs across the dot chain (64 rows = 16 f32 vregs).
    RB = 64 if TM % 64 == 0 else (32 if TM % 32 == 0 else 16)
    kernel = functools.partial(longconv_kernel, rb=RB)

    out_wide = pl.pallas_call(
        kernel,
        out_shape=jax.ShapeDtypeStruct((Rpad, OUT), out_dtype),
        grid_spec=pltpu.PrefetchScalarGridSpec(
            num_scalar_prefetch=0,
            grid=(nM,),
            in_specs=[
                pl.BlockSpec((TM, E), lambda j: (j, 0)),               # body tile
                pl.BlockSpec((HALO, E),
                             lambda j: ((j + 1) * (TM // HALO), 0)),   # 16-row halo
                # Constant index_maps: fetched once, resident across the grid.
                pl.BlockSpec((3, E, NUM_FILTERS), lambda j: (0, 0, 0)),
                pl.BlockSpec((2, E, K5_COLS), lambda j: (0, 0, 0)),
                pl.BlockSpec((1, NUM_FILTERS), lambda j: (0, 0)),
                pl.BlockSpec((NUM_FILTERS, OUT), lambda j: (0, 0)),
                pl.BlockSpec((1, OUT), lambda j: (0, 0)),
            ],
            out_specs=pl.BlockSpec((TM, OUT), lambda j: (j, 0)),
            scratch_shapes=[
                pltpu.VMEM((RB + HALO, E), jnp.bfloat16),
            ]),
        compiler_params=pltpu.CompilerParams(
            dimension_semantics=("parallel",),
            vmem_limit_bytes=32 * 1024 * 1024),
    )(xg, xg, wmid, wout, bcat, pw, pb)

    # Per-batch padding rows (and the Rpad-R tail) are scratch rows; drop them.
    # TODO(synk): for L >> tile_m, switch to a (batch, seq-tile) grid writing a
    # (B, L, OUT) output directly so this slice pass disappears.
    return out_wide[:R].reshape(B, Lp, OUT)[:, MAX_PAD:MAX_PAD + L, :]


def reference(tokens, embed_table, conv_ws, conv_bs, proj_w, proj_b):
    """Pure-JAX replica of the PyTorch forward (NCL conv layout, f32)."""
    x = embed_table[tokens].astype(jnp.float32)                    # (B, L, E)
    x_ncl = jnp.transpose(x, (0, 2, 1))                            # (B, E, L)
    hs = []
    for w, b in zip(conv_ws, conv_bs):
        k = w.shape[-1]
        pad = (k - 1) // 2
        y = jax.lax.conv_general_dilated(
            x_ncl, w, window_strides=(1,), padding=[(pad, pad)],
            dimension_numbers=('NCH', 'OIH', 'NCH'),
            precision=jax.lax.Precision.HIGHEST)
        y = y + b[None, :, None]
        hs.append(jax.nn.relu(y))
    cat = jnp.concatenate(hs, axis=1)                              # (B, 256, L)
    cat = jnp.transpose(cat, (0, 2, 1))                            # (B, L, 256)
    return jnp.einsum('blf,of->blo', cat, proj_w,
                      precision=jax.lax.Precision.HIGHEST) + proj_b


if __name__ == "__main__":
    B, L, VOCAB = 2, 16, 32

    key = jax.random.PRNGKey(0)
    keys = jax.random.split(key, 12)

    tokens = jax.random.randint(keys[0], (B, L), 0, VOCAB, dtype=jnp.int32)
    embed_table = jax.random.normal(keys[1], (VOCAB, EMB), jnp.float32) * 0.1

    conv_ws, conv_bs = [], []
    for i, (k, oc) in enumerate(CONV_FILTERS):
        scale = 1.0 / float(np.sqrt(EMB * k))
        conv_ws.append(jax.random.normal(keys[2 + 2 * i], (oc, EMB, k),
                                         jnp.float32) * scale)
        conv_bs.append(jax.random.normal(keys[3 + 2 * i], (oc,),
                                         jnp.float32) * 0.01)

    proj_w = jax.random.normal(keys[10], (OUT, NUM_FILTERS), jnp.float32) \
        * (1.0 / float(np.sqrt(NUM_FILTERS)))
    proj_b = jax.random.normal(keys[11], (OUT,), jnp.float32) * 0.01

    out = long_conv_embedding(tokens, embed_table, conv_ws, conv_bs,
                              proj_w, proj_b)
    out = jax.block_until_ready(out)

    ref = reference(tokens, embed_table, conv_ws, conv_bs, proj_w, proj_b)
    ref = jax.block_until_ready(ref)

    assert out.shape == (B, L, OUT), out.shape
    # bf16 inputs / f32 accumulation vs. an all-f32 HIGHEST-precision reference:
    # tolerance relaxed accordingly (review-sanctioned accuracy tradeoff).
    np.testing.assert_allclose(np.asarray(out, dtype=np.float32),
                               np.asarray(ref, dtype=np.float32),
                               rtol=5e-2, atol=5e-3)
    print("KERNEL_OK")
</pallas_src>

<mosaic_0001>
module attributes {stable_mosaic.version = 11 : i64} {
  func.func @longconv_kernel(%arg0: i32, %arg1: memref<32x256xbf16, #tpu.memory_space<vmem>>, %arg2: memref<16x256xbf16, #tpu.memory_space<vmem>>, %arg3: memref<3x256x256xbf16, #tpu.memory_space<vmem>>, %arg4: memref<2x256x128xbf16, #tpu.memory_space<vmem>>, %arg5: memref<1x256xf32, #tpu.memory_space<vmem>>, %arg6: memref<256x256xbf16, #tpu.memory_space<vmem>>, %arg7: memref<1x256xf32, #tpu.memory_space<vmem>>, %arg8: memref<32x256xf32, #tpu.memory_space<vmem>>, %arg9: memref<48x256xbf16, #tpu.memory_space<vmem>>) attributes {dimension_semantics = [#tpu.dimension_semantics<parallel>], iteration_bounds = array<i64: 2>, scalar_prefetch = 0 : i64, scratch_operands = 1 : i64, tpu.core_type = #tpu.core_type<tc>, window_params = [{transform_indices = @transform_0, window_bounds = array<i64: 32, 256>}, {transform_indices = @transform_1, window_bounds = array<i64: 16, 256>}, {pipeline_mode = #tpu.pipeline_mode<synchronous>, transform_indices = @transform_2, window_bounds = array<i64: 3, 256, 256>}, {pipeline_mode = #tpu.pipeline_mode<synchronous>, transform_indices = @transform_3, window_bounds = array<i64: 2, 256, 128>}, {pipeline_mode = #tpu.pipeline_mode<synchronous>, transform_indices = @transform_4, window_bounds = array<i64: 1, 256>}, {pipeline_mode = #tpu.pipeline_mode<synchronous>, transform_indices = @transform_5, window_bounds = array<i64: 256, 256>}, {pipeline_mode = #tpu.pipeline_mode<synchronous>, transform_indices = @transform_6, window_bounds = array<i64: 1, 256>}, {transform_indices = @transform_7, window_bounds = array<i64: 32, 256>}]} {
    %c0 = arith.constant 0 : index
    %c0_0 = arith.constant 0 : index
    %0 = vector.load %arg5[%c0, %c0_0] : memref<1x256xf32, #tpu.memory_space<vmem>>, vector<1x128xf32>
    %c0_1 = arith.constant 0 : index
    %c128 = arith.constant 128 : index
    %1 = vector.load %arg5[%c0_1, %c128] : memref<1x256xf32, #tpu.memory_space<vmem>>, vector<1x128xf32>
    %c0_2 = arith.constant 0 : index
    %c0_3 = arith.constant 0 : index
    %2 = vector.load %arg7[%c0_2, %c0_3] : memref<1x256xf32, #tpu.memory_space<vmem>>, vector<1x256xf32>
    %c0_4 = arith.constant 0 : index
    %c0_5 = arith.constant 0 : index
    %3 = vector.load %arg1[%c0_4, %c0_5] : memref<32x256xbf16, #tpu.memory_space<vmem>>, vector<32x256xbf16>
    %c0_6 = arith.constant 0 : index
    %c0_7 = arith.constant 0 : index
    %4 = vector.load %arg9[%c0_6, %c0_7] : memref<48x256xbf16, #tpu.memory_space<vmem>>, vector<32x256xbf16>
    tpu.vector_store %arg9[%c0_6, %c0_7], %3 {strides = array<i32>} : memref<48x256xbf16, #tpu.memory_space<vmem>>, vector<32x256xbf16>,
    %c0_8 = arith.constant 0 : index
    %c0_9 = arith.constant 0 : index
    %5 = vector.load %arg2[%c0_8, %c0_9] : memref<16x256xbf16, #tpu.memory_space<vmem>>, vector<16x256xbf16>
    %c32 = arith.constant 32 : index
    %c0_10 = arith.constant 0 : index
    %6 = vector.load %arg9[%c32, %c0_10] : memref<48x256xbf16, #tpu.memory_space<vmem>>, vector<16x256xbf16>
    tpu.vector_store %arg9[%c32, %c0_10], %5 {strides = array<i32>} : memref<48x256xbf16, #tpu.memory_space<vmem>>, vector<16x256xbf16>,
    %c1 = arith.constant 1 : index
    %c0_11 = arith.constant 0 : index
    %7 = vector.load %arg9[%c1, %c0_11] : memref<48x256xbf16, #tpu.memory_space<vmem>>, vector<32x256xbf16>
    %c0_12 = arith.constant 0 : index
    %c0_13 = arith.constant 0 : index
    %c0_14 = arith.constant 0 : index
    %8 = vector.load %arg3[%c0_12, %c0_13, %c0_14] : memref<3x256x256xbf16, #tpu.memory_space<vmem>>, vector<1x256x256xbf16>
    %9 = vector.shape_cast %8 : vector<1x256x256xbf16> to vector<256x256xbf16>
    %cst = arith.constant dense<0.000000e+00> : vector<32x256xf32>
    %10 = tpu.matmul %7, %9, %cst {dimension_numbers = #tpu.dot_dimension_numbers<[1], [0], [0], [1], [0, 0, 1, 1], [], []>} : vector<32x256xbf16>, vector<256x256xbf16>, vector<32x256xf32> -> vector<32x256xf32>
    %c2 = arith.constant 2 : index
    %c0_15 = arith.constant 0 : index
    %11 = vector.load %arg9[%c2, %c0_15] : memref<48x256xbf16, #tpu.memory_space<vmem>>, vector<32x256xbf16>
    %c1_16 = arith.constant 1 : index
    %c0_17 = arith.constant 0 : index
    %c0_18 = arith.constant 0 : index
    %12 = vector.load %arg3[%c1_16, %c0_17, %c0_18] : memref<3x256x256xbf16, #tpu.memory_space<vmem>>, vector<1x256x256xbf16>
    %13 = vector.shape_cast %12 : vector<1x256x256xbf16> to vector<256x256xbf16>
    %cst_19 = arith.constant dense<0.000000e+00> : vector<32x256xf32>
    %14 = tpu.matmul %11, %13, %cst_19 {dimension_numbers = #tpu.dot_dimension_numbers<[1], [0], [0], [1], [0, 0, 1, 1], [], []>} : vector<32x256xbf16>, vector<256x256xbf16>, vector<32x256xf32> -> vector<32x256xf32>
    %15 = arith.addf %10, %14 : vector<32x256xf32>
    %c3 = arith.constant 3 : index
    %c0_20 = arith.constant 0 : index
    %16 = vector.load %arg9[%c3, %c0_20] : memref<48x256xbf16, #tpu.memory_space<vmem>>, vector<32x256xbf16>
    %c2_21 = arith.constant 2 : index
    %c0_22 = arith.constant 0 : index
    %c0_23 = arith.constant 0 : index
    %17 = vector.load %arg3[%c2_21, %c0_22, %c0_23] : memref<3x256x256xbf16, #tpu.memory_space<vmem>>, vector<1x256x256xbf16>
    %18 = vector.shape_cast %17 : vector<1x256x256xbf16> to vector<256x256xbf16>
    %cst_24 = arith.constant dense<0.000000e+00> : vector<32x256xf32>
    %19 = tpu.matmul %16, %18, %cst_24 {dimension_numbers = #tpu.dot_dimension_numbers<[1], [0], [0], [1], [0, 0, 1, 1], [], []>} : vector<32x256xbf16>, vector<256x256xbf16>, vector<32x256xf32> -> vector<32x256xf32>
    %20 = arith.addf %15, %19 : vector<32x256xf32>
    %c0_25 = arith.constant 0 : index
    %c0_26 = arith.constant 0 : index
    %21 = vector.load %arg9[%c0_25, %c0_26] : memref<48x256xbf16, #tpu.memory_space<vmem>>, vector<32x256xbf16>
    %c0_27 = arith.constant 0 : index
    %c0_28 = arith.constant 0 : index
    %c0_29 = arith.constant 0 : index
    %22 = vector.load %arg4[%c0_27, %c0_28, %c0_29] : memref<2x256x128xbf16, #tpu.memory_space<vmem>>, vector<1x256x128xbf16>
    %23 = vector.shape_cast %22 : vector<1x256x128xbf16> to vector<256x128xbf16>
    %cst_30 = arith.constant dense<0.000000e+00> : vector<32x128xf32>
    %24 = tpu.matmul %21, %23, %cst_30 {dimension_numbers = #tpu.dot_dimension_numbers<[1], [0], [0], [1], [0, 0, 1, 1], [], []>} : vector<32x256xbf16>, vector<256x128xbf16>, vector<32x128xf32> -> vector<32x128xf32>
    %c4 = arith.constant 4 : index
    %c0_31 = arith.constant 0 : index
    %25 = vector.load %arg9[%c4, %c0_31] : memref<48x256xbf16, #tpu.memory_space<vmem>>, vector<32x256xbf16>
    %c1_32 = arith.constant 1 : index
    %c0_33 = arith.constant 0 : index
    %c0_34 = arith.constant 0 : index
    %26 = vector.load %arg4[%c1_32, %c0_33, %c0_34] : memref<2x256x128xbf16, #tpu.memory_space<vmem>>, vector<1x256x128xbf16>
    %27 = vector.shape_cast %26 : vector<1x256x128xbf16> to vector<256x128xbf16>
    %cst_35 = arith.constant dense<0.000000e+00> : vector<32x128xf32>
    %28 = tpu.matmul %25, %27, %cst_35 {dimension_numbers = #tpu.dot_dimension_numbers<[1], [0], [0], [1], [0, 0, 1, 1], [], []>} : vector<32x256xbf16>, vector<256x128xbf16>, vector<32x128xf32> -> vector<32x128xf32>
    %29 = arith.addf %24, %28 : vector<32x128xf32>
    %30 = vector.extract_strided_slice %20 {offsets = [0, 0], sizes = [32, 128], strides = [1, 1]} : vector<32x256xf32> to vector<32x128xf32>
    %31 = vector.broadcast %0 : vector<1x128xf32> to vector<32x128xf32>
    %32 = arith.addf %30, %31 : vector<32x128xf32>
    %33 = vector.extract_strided_slice %20 {offsets = [0, 128], sizes = [32, 128], strides = [1, 1]} : vector<32x256xf32> to vector<32x128xf32>
    %34 = vector.broadcast %1 : vector<1x128xf32> to vector<32x128xf32>
    %35 = arith.addf %33, %34 : vector<32x128xf32>
    %36 = arith.addf %35, %29 : vector<32x128xf32>
    %cst_36 = arith.constant 0.000000e+00 : f32
    %37 = vector.broadcast %cst_36 : f32 to vector<32x128xf32>
    %38 = arith.maximumf %32, %37 : vector<32x128xf32>
    %cst_37 = arith.constant 0.000000e+00 : f32
    %39 = vector.broadcast %cst_37 : f32 to vector<32x128xf32>
    %40 = arith.maximumf %36, %39 : vector<32x128xf32>
    %41 = tpu.concatenate %38, %40 in 1 : vector<32x128xf32>, vector<32x128xf32> -> vector<32x256xf32>
    %42 = arith.truncf %41 : vector<32x256xf32> to vector<32x256xbf16>
    %c0_38 = arith.constant 0 : index
    %c0_39 = arith.constant 0 : index
    %43 = vector.load %arg6[%c0_38, %c0_39] : memref<256x256xbf16, #tpu.memory_space<vmem>>, vector<256x256xbf16>
    %cst_40 = arith.constant dense<0.000000e+00> : vector<32x256xf32>
    %44 = tpu.matmul %42, %43, %cst_40 {dimension_numbers = #tpu.dot_dimension_numbers<[1], [0], [0], [1], [0, 0, 1, 1], [], []>} : vector<32x256xbf16>, vector<256x256xbf16>, vector<32x256xf32> -> vector<32x256xf32>
    %45 = vector.broadcast %2 : vector<1x256xf32> to vector<32x256xf32>
    %46 = arith.addf %44, %45 : vector<32x256xf32>
    %c0_41 = arith.constant 0 : index
    %c0_42 = arith.constant 0 : index
    %47 = vector.load %arg8[%c0_41, %c0_42] : memref<32x256xf32, #tpu.memory_space<vmem>>, vector<32x256xf32>
    tpu.vector_store %arg8[%c0_41, %c0_42], %46 {strides = array<i32>} : memref<32x256xf32, #tpu.memory_space<vmem>>, vector<32x256xf32>,
    return
  }
  func.func @transform_0(%arg0: i32) -> (i32, i32) {
    %c0_i32 = arith.constant 0 : i32
    %c0_i32_0 = arith.constant 0 : i32
    return %arg0, %c0_i32 : i32, i32
  }
  func.func @transform_1(%arg0: i32) -> (i32, i32) {
    %c1_i32 = arith.constant 1 : i32
    %0 = arith.addi %arg0, %c1_i32 : i32
    %c2_i32 = arith.constant 2 : i32
    %1 = arith.muli %0, %c2_i32 : i32
    %c0_i32 = arith.constant 0 : i32
    %c0_i32_0 = arith.constant 0 : i32
    return %1, %c0_i32 : i32, i32
  }
  func.func @transform_2(%arg0: i32) -> (i32, i32, i32) {
    %c0_i32 = arith.constant 0 : i32
    %c0_i32_0 = arith.constant 0 : i32
    %c0_i32_1 = arith.constant 0 : i32
    %c0_i32_2 = arith.constant 0 : i32
    return %c0_i32, %c0_i32_0, %c0_i32_1 : i32, i32, i32
  }
  func.func @transform_3(%arg0: i32) -> (i32, i32, i32) {
    %c0_i32 = arith.constant 0 : i32
    %c0_i32_0 = arith.constant 0 : i32
    %c0_i32_1 = arith.constant 0 : i32
    %c0_i32_2 = arith.constant 0 : i32
    return %c0_i32, %c0_i32_0, %c0_i32_1 : i32, i32, i32
  }
  func.func @transform_4(%arg0: i32) -> (i32, i32) {
    %c0_i32 = arith.constant 0 : i32
    %c0_i32_0 = arith.constant 0 : i32
    %c0_i32_1 = arith.constant 0 : i32
    return %c0_i32, %c0_i32_0 : i32, i32
  }
  func.func @transform_5(%arg0: i32) -> (i32, i32) {
    %c0_i32 = arith.constant 0 : i32
    %c0_i32_0 = arith.constant 0 : i32
    %c0_i32_1 = arith.constant 0 : i32
    return %c0_i32, %c0_i32_0 : i32, i32
  }
  func.func @transform_6(%arg0: i32) -> (i32, i32) {
    %c0_i32 = arith.constant 0 : i32
    %c0_i32_0 = arith.constant 0 : i32
    %c0_i32_1 = arith.constant 0 : i32
    return %c0_i32, %c0_i32_0 : i32, i32
  }
  func.func @transform_7(%arg0: i32) -> (i32, i32) {
    %c0_i32 = arith.constant 0 : i32
    %c0_i32_0 = arith.constant 0 : i32
    return %arg0, %c0_i32 : i32, i32
  }
}

</mosaic_0001>

<bundles_post_ra>
// kernel: tpu_custom_call.1
= control target key start
LH: loop header
LB: loop body
LE: loop exit
PB: predicated region body
PF: predicated region fallthrough
CT: control target
= control target key end

     0   :  { %s3538_s0 = inlined_call_operand.hbm [shape: bf16[80,256], index: 0, kind: input, shape index: {}]   ;;  %s3539_s1 = inlined_call_operand.hbm [shape: bf16[80,256], index: 1, kind: input, shape index: {}]   ;;  %s3540_s2 = inlined_call_operand.hbm [shape: bf16[3,256,256], index: 2, kind: input, shape index: {}]   ;;  %s3541_s3 = inlined_call_operand.hbm [shape: bf16[2,256,128], index: 3, kind: input, shape index: {}]   ;;  %s3542_s4 = inlined_call_operand.vmem [shape: f32[1,256], index: 4, kind: input, shape index: {}]   ;;  %s3543_s5 = inlined_call_operand.hbm [shape: bf16[256,256], index: 5, kind: input, shape index: {}]   ;;  %s3544_s6 = inlined_call_operand.vmem [shape: f32[1,256], index: 6, kind: input, shape index: {}]   ;;  %s3545_s7 = inlined_call_operand.hbm [shape: f32[64,256], index: 7, kind: output, shape index: {}]  }
   0x1   :  { %3560 = sst [smem:[#allocation24_spill]] %s3541_s3 }
   0x2   :  { %3561 = sst [smem:[#allocation25_spill]] %s3542_s4 }
   0x3   :  { %3562 = sst [smem:[#allocation26_spill]] %s3544_s6 }
   0x4   :  { %3563 = sst [smem:[#allocation27_spill]] %s3545_s7 }
   0x5   :  { %12 = vsyncpa [#allocation4], 0 }
   0x6   :  { %14 = vsyncpa [#allocation4 + $0x1], 0 }
   0x7   :  { %15 = vsyncpa [#allocation7], 0 }
   0x8   :  { %17 = vsyncpa [#allocation7 + $0x1], 0 }
   0x9   :  { %18 = vsyncpa [#allocation10], 0 }
   0xa   :  { %19 = vsyncpa [#allocation5], 0 }
   0xb   :  { %21 = vsyncpa [#allocation5 + $0x1], 0  ;;  %s3063_s24 = smov 0   ;;  %s3065_s25 = smov 0  }
   0xc   :  { %s3067_s26 = smov 0   ;;  %s3069_s27 = smov 0  }
   0xd   :  { %s3071_s28 = smov 0   ;;  %s3073_s29 = smov 0  }
   0xe   :  { %s3075_s30 = smov 0  }
   0xf LB: > { %3564 = sst [smem:[#allocation18_spill]] %s2993_s27  ;;  %s3097_s8 = sadd.s32 4294967295, %s3005_s30   ;;  %s3005_s30 = sphi %s3075_s30, %s3597_s30   ;;  %s3001_s29 = sphi %s3073_s29, %s3605_s29   ;;  %s2997_s28 = sphi %s3071_s28, %s3604_s28   ;;  %s2993_s27 = sphi %s3069_s27, %s3603_s27   ;;  %s2989_s26 = sphi %s3067_s26, %s3602_s26   ;;  %s2985_s25 = sphi %s3065_s25, %s3601_s25   ;;  %s2981_s24 = sphi %s3063_s24, %s3600_s24  }
  0x10   : > { %s2139_s9 = sadd.s32 4294967294, %s3005_s30   ;;  %s3101_s10 = sadd.s32 1, %s3005_s30  }
  0x11   : > { %3565 = sst [smem:[#allocation19_spill]] %s3101_s10  ;;  %s34_s11 = sadd.s32 1, %s3001_s29 }
  0x12   : > { %s31_s12 = ssub.s32 %s3005_s30, %s3101_s10  ;;  %p41_p0 = scmp.ne.s32.totalorder %s3001_s29, %s2997_s28 }
  0x13   : > { %p32_p1 = scmp.eq.s32.totalorder %s31_s12, 0  ;;  %p42_p2 = scmp.eq.s32.totalorder %s3005_s30, 0 }
  0x14   : > { %p47_p3 = scmp.ne.s32.totalorder %s2997_s28, %s2993_s27  ;;  %p3551_p4 = scmp.eq.s32.totalorder %s3097_s8, 0 }
  0x15   : > { %s3113_s13 = scalar_select %p32_p1, %s3001_s29, %s34_s11  }
  0x16   : > { %p3120_p5 = por %p42_p2, %p41_p0  ;;  %p3129_p6 = por %p3551_p4, %p47_p3 }
  0x17   : > { %3566 = sst [smem:[#allocation20_spill]] %s3113_s13  ;;  %s2339_s16 = sshll.u32 %s3005_s30, 1 }
  0x18   : > { %s3567_s14 = scalar_select %p3120_p5, 1, 0 }
  0x19   : > { %s3568_s15 = scalar_select %p3129_p6, 1, 0 }
  0x1a   : > { %s64_s17 = sadd.s32 1, %s2989_s26  ;;  %s2340_s18 = sadd.s32 2, %s2339_s16 }
  0x1b   : > { %p71_p7 = scmp.ne.s32.totalorder %s2989_s26, %s2985_s25  ;;  %s2342_s19 = sadd.s32 2, %s2340_s18 }
  0x1c   : > { %p77_p8 = scmp.ne.s32.totalorder %s2985_s25, %s2981_s24  ;;  %s61_s20 = ssub.s32 %s2340_s18, %s2342_s19 }
  0x1d   : > { %p3140_p9 = por %p71_p7, %p42_p2  ;;  %p62_p10 = scmp.eq.s32.totalorder %s61_s20, 0 }
  0x1e   : > { %p3146_p11 = por %p77_p8, %p3551_p4  ;;  %p206_p12 = scmp.eq.s32.totalorder %s3097_s8, 1 }
  0x1f   : > { %s3569_s21 = scalar_select %p3140_p9, 1, 0 }
  0x20   : > { %s3570_s22 = scalar_select %p3146_p11, 1, 0 }
  0x21   : > { %p212_p13 = scmp.eq.s32.totalorder %s2139_s9, 1  ;;  %p3157_p1 = por %p206_p12, %p41_p0 }
  0x22   : > { %s3152_s23 = scalar_select %p62_p10, %s2989_s26, %s64_s17  }
  0x23   : > { %s3572_s24 = scalar_select %p3157_p1, 1, 0 }
  0x24   : > { %3571 = sst [smem:[#allocation21_spill]] %s3152_s23  ;;  %p3164_p2 = por %p212_p13, %p47_p3 }
  0x25   : > { %3573 = sst [smem:[#allocation22_spill]] %s3572_s24  ;;  %p2142_p7 = scmp.ge.s32.totalorder %s3005_s30, 1 }
  0x26   : > { %s3574_s11 = scalar_select %p3164_p2, 1, 0 }
  0x27   : > { %p219_p6 = scmp.lt.s32.totalorder %s3005_s30, 3  ;;  %s3007_s9 = smov [#allocation9]  }
  0x28   : > { %3575 = sst [smem:[#allocation23_spill]] %s3574_s11  ;;  %s244_s16 = sshll.u32 %s3007_s9, 4  ;;  %s245_s16 = int_to_ptr.vmem [resolvable:$true] %s244_s16 }
  0x29   : > { %p3170_p8 = pnand %p2142_p7, %p219_p6  ;;  %s3008_s18 = smov [#allocation8]  }
  0x2a   : > { %s231_s19 = sshll.u32 %s3008_s18, 4  ;;  %s3578_s3 = sld [smem:[#allocation24_spill]]  ;;  %s3182_s19 = int_to_ptr.vmem [resolvable:$true] %s231_s19 }
  0x2b   : > { %s3576_s12 = scalar_select %p3170_p8, 1, 0 }
  0x2c   : > { %p2439_p0 = pneg %p3170_p8 }
  0x2e   : > { %p3178_p10 = pnand %p2439_p0, %p3551_p4 }
  0x30   : > { %s2762_s23 = scalar_lea.hbm %s3578_s3, 4096  ;;  %p3192_p6 = pneg %p3178_p10 }
  0x31   : > { %p2763_p3 = scmp.ne.s32.totalorder %s3578_s3, %s2762_s23  ;;  %p2769_p7 = scmp.lt.u32.totalorder %s2762_s23, %s3578_s3 }
  0x33   : > { %p2765_p12 = pnand %p3192_p6, %p2763_p3 }
  0x35   : > { %p2766_p13 = pneg %p2765_p12 }
  0x37   : > { %p2771_p0 = pnand %p2769_p7, %p2766_p13 }
  0x39   : > { %2774 = shalt.err (!%p2771_p0)
}
  0x3a   : > { %s2775_s13 = scalar_lea.vmem %s245_s16, 4096  ;;  %p2783_p11 = scmp.lt.s32.totalorder %s245_s16, %s245_s16 }
  0x3b   : > { %p2776_p4 = scmp.ne.s32.totalorder %s245_s16, %s2775_s13  ;;  %p2784_p8 = scmp.lt.s32.totalorder %s2775_s13, %s2775_s13 }
  0x3d   : > { %p2778_p2 = pnand %p2776_p4, %p3192_p6  ;;  %p2785_p9 = por %p2784_p8, %p2783_p11 }
  0x3f   : > { %p2779_p1 = pneg %p2778_p2 }
  0x41   : > { %p2786_p5 = pnand %p2785_p9, %p2779_p1 }
  0x43   : > { %2789 = shalt.err (!%p2786_p5)
}
  0x44   : > { %s3009_s10 = smov 64   ;;  %s3010_s11 = smov 4  }
  0x45   : > { %2445 = dma.hbm_to_vmem [thread:$0]  (!%p3178_p10), %s3578_s3, 4096, %s245_s16, [#allocation10], %s3009_s10, %s3009_s10, %s3010_s11  }
  0x46   : > { %s2790_s7 = scalar_lea.hbm %s3540_s2, 12288 }
  0x47   : > { %p2791_p4 = scmp.ne.s32.totalorder %s3540_s2, %s2790_s7  ;;  %p2797_p11 = scmp.lt.u32.totalorder %s2790_s7, %s3540_s2 }
  0x49   : > { %p2793_p9 = pnand %p2791_p4, %p3192_p6 }
  0x4b   : > { %p2794_p5 = pneg %p2793_p9 }
  0x4d   : > { %p2799_p1 = pnand %p2797_p11, %p2794_p5 }
  0x4f   : > { %2802 = shalt.err (!%p2799_p1)
}
  0x50   : > { %s2803_s16 = scalar_lea.vmem %s3182_s19, 12288  ;;  %p2811_p12 = scmp.lt.s32.totalorder %s3182_s19, %s3182_s19 }
  0x51   : > { %p2804_p2 = scmp.ne.s32.totalorder %s3182_s19, %s2803_s16  ;;  %p2812_p13 = scmp.lt.s32.totalorder %s2803_s16, %s2803_s16 }
  0x53   : > { %p2806_p8 = pnand %p2804_p2, %p3192_p6  ;;  %p2813_p7 = por %p2812_p13, %p2811_p12 }
  0x55   : > { %p2807_p3 = pneg %p2806_p8 }
  0x57   : > { %p2814_p0 = pnand %p2813_p7, %p2807_p3 }
  0x59   : > { %2817 = shalt.err (!%p2814_p0)
}
  0x5a   : > { %s3011_s6 = smov 128   ;;  %s3012_s4 = smov 8  }
  0x5b   : > { %2442 = dma.hbm_to_vmem [thread:$0]  (!%p3178_p10), %s3540_s2, 12288, %s3182_s19, [#allocation7], %s3011_s6, %s3011_s6, %s3012_s4  }
  0x5c   : > { %s3013_s10 = smov [#allocation11]   ;;  %s2818_s20 = scalar_lea.hbm %s3543_s5, 4096 }
  0x5d   : > { %s260_s11 = sshll.u32 %s3013_s10, 4  ;;  %p2819_p4 = scmp.ne.s32.totalorder %s3543_s5, %s2818_s20  ;;  %s261_s11 = int_to_ptr.vmem [resolvable:$true] %s260_s11 }
  0x5e   : > { %p2825_p11 = scmp.lt.u32.totalorder %s2818_s20, %s3543_s5 }
  0x5f   : > { %p2821_p9 = pnand %p2819_p4, %p3192_p6 }
  0x61   : > { %p2822_p5 = pneg %p2821_p9 }
  0x63   : > { %p2827_p1 = pnand %p2825_p11, %p2822_p5 }
  0x65   : > { %2830 = shalt.err (!%p2827_p1)
}
  0x66   : > { %s2831_s19 = scalar_lea.vmem %s261_s11, 4096  ;;  %p2839_p12 = scmp.lt.s32.totalorder %s261_s11, %s261_s11 }
  0x67   : > { %p2832_p2 = scmp.ne.s32.totalorder %s261_s11, %s2831_s19  ;;  %p2840_p13 = scmp.lt.s32.totalorder %s2831_s19, %s2831_s19 }
  0x69   : > { %p2834_p8 = pnand %p2832_p2, %p3192_p6  ;;  %p2841_p7 = por %p2840_p13, %p2839_p12 }
  0x6b   : > { %p2835_p3 = pneg %p2834_p8 }
  0x6d   : > { %p2842_p0 = pnand %p2841_p7, %p2835_p3 }
  0x6f   : > { %2845 = shalt.err (!%p2842_p0)
}
  0x70   : > { %2448 = dma.hbm_to_vmem [thread:$0]  (!%p3178_p10), %s3543_s5, 4096, %s261_s11, [#allocation10], %s3011_s6, %s3011_s6, %s3012_s4  }
  0x71   : > { %p2146_p4 = scmp.ge.s32.totalorder %s3005_s30, 2 }
  0x72   : > { %p3580_p9 = scmp.ne.s32.totalorder (!%p2146_p4), %s3567_s14, 0 }
  0x73   : > { %273 = sbr.rel (%p2146_p4) target bundleno = 185 (0xb9), region = 36 }
  0x7a   : > { %276 = sbr.rel (!%p3580_p9) target bundleno = 157 (0x9d), region = 40  ;;  %s277_s3 = sand.u32 (%p3580_p9), 1, %s3001_s29  }
  0x7b   : > { %s2148_s9 = sshll.u32 (%p3580_p9), %s3005_s30, 2  ;;  %s2147_s10 = sshll.u32 (%p3580_p9), %s277_s3, 5 }
  0x7c   : > { %s283_s27 = ssub.s32 (%p3580_p9), 10, %s2148_s9  ;;  %s3259_s4 = scalar_lea.sflag (%p3580_p9), [#allocation4], %s277_s3 }
  0x7d   : > { %p284_p6 = scmp.lt.s32.totalorder (%p3580_p9), %s283_s27, 4  ;;  %s281_s11 = scalar_lea.vmem (%p3580_p9), [#allocation3], %s2147_s10 }
  0x81   : > { %s3607_s27 = smov (!%p284_p6, %s283_s27), 4 }
  0x82   : > { %s3256_s17 = sshll.u32 %s3607_s27, 7 }
  0x83   : > { %s289_s6 = ssub.s32 512, %s3256_s17 }
  0x84   : > { %290 = vsyncadd %s3259_s4, %s289_s6  ;;  %p2151_p10 = scmp.ne.s32.totalorder %s3256_s17, 0  ;;  %s2345_s14 = sshll.u32 %s3005_s30, 9 }
  0x85   : > { %s3267_s18 = scalar_lea.hbm %s3538_s0, %s2345_s14  ;;  %s296_s13 = sshll.u32 %s281_s11, 4  ;;  %s3269_s13 = int_to_ptr.vmem [resolvable:$true] %s296_s13 }
  0x86   : > { %s2846_s16 = scalar_lea.hbm %s3267_s18, %s3256_s17  ;;  %s2850_s24 = scalar_lea.hbm %s3538_s0, 1280 }
  0x87   : > { %p2847_p5 = scmp.ne.s32.totalorder %s3267_s18, %s2846_s16  ;;  %p2851_p2 = scmp.lt.u32.totalorder %s3267_s18, %s3538_s0 }
  0x88   : > { %p2852_p8 = scmp.lt.u32.totalorder %s2850_s24, %s2846_s16  ;;  %p2854_p12 = scmp.lt.u32.totalorder %s2846_s16, %s3267_s18 }
  0x89   : > { %p2848_p11 = pnand %p2847_p5, %p2151_p10 }
  0x8a   : > { %p2853_p3 = por %p2852_p8, %p2851_p2 }
  0x8b   : > { %p2849_p1 = pneg %p2848_p11 }
  0x8c   : > { %p2855_p13 = por %p2854_p12, %p2853_p3 }
  0x8e   : > { %p2856_p7 = pnand %p2855_p13, %p2849_p1 }
  0x90   : > { %2859 = shalt.err (!%p2856_p7)
}
  0x91   : > { %s2860_s10 = scalar_lea.vmem %s3269_s13, %s3256_s17  ;;  %s3014_s27 = smov [#allocation3]  }
  0x92   : > { %p2861_p0 = scmp.ne.s32.totalorder %s3269_s13, %s2860_s10  ;;  %s2864_s6 = sshll.u32 %s3014_s27, 4  ;;  %s2865_s6 = int_to_ptr.vmem [resolvable:$false] %s2864_s6 }
  0x93   : > { %s2866_s11 = scalar_lea.vmem %s2865_s6, 1024  ;;  %p2867_p5 = scmp.lt.s32.totalorder %s3269_s13, %s2865_s6 }
  0x94   : > { %p2862_p9 = pnand %p2861_p0, %p2151_p10  ;;  %p2868_p11 = scmp.lt.s32.totalorder %s2866_s11, %s2860_s10 }
  0x96   : > { %p2863_p6 = pneg %p2862_p9  ;;  %p2869_p2 = por %p2868_p11, %p2867_p5 }
  0x98   : > { %p2870_p8 = pnand %p2869_p2, %p2863_p6 }
  0x9a   : > { %2873 = shalt.err (!%p2870_p8)
}
  0x9b   : > { %s3015_s14 = smov 128   ;;  %s3016_s23 = smov 8  }
  0x9c   : > { %302 = dma.hbm_to_vmem [thread:$0]  (%p2151_p10), %s3267_s18, %s3256_s17, %s3269_s13, %s3259_s4, %s3015_s14, %s3015_s14, %s3016_s23  }
  0x9d PF: > { %s306_s20 = sand.u32 1, %s3005_s30   ;;  %s308_s16 = sand.u32 1, %s2989_s26  }
  0x9e   : > { %s2156_s19 = sshll.u32 %s308_s16, 4  ;;  %s2157_s7 = sshll.u32 %s3005_s30, 9 }
  0x9f   : > { %s2054_s9 = scalar_lea.hbm %s3539_s1, %s2157_s7  ;;  %s310_s10 = scalar_lea.vmem [#allocation6], %s2156_s19 }
  0xa0   : > { %s320_s27 = sshll.u32 %s310_s10, 4  ;;  %s3302_s6 = scalar_lea.hbm %s2054_s9, 512  ;;  %s3304_s27 = int_to_ptr.vmem [resolvable:$true] %s320_s27 }
  0xa1   : > { %s3306_s17 = scalar_lea.sflag [#allocation7], %s306_s20  ;;  %s2902_s4 = scalar_lea.hbm %s2054_s9, 768 }
  0xa2   : > { %p2875_p10 = scmp.ne.s32.totalorder %s3302_s6, %s2902_s4  ;;  %p3581_p1 = scmp.ne.s32.totalorder %s3569_s21, 0 }
  0xa3   : > { %s2878_s11 = scalar_lea.hbm %s3539_s1, 1280  ;;  %p2879_p13 = scmp.lt.u32.totalorder %s3302_s6, %s3539_s1 }
  0xa4   : > { %p2876_p3 = pnand %p2875_p10, %p3581_p1  ;;  %p2880_p7 = scmp.lt.u32.totalorder %s2878_s11, %s2902_s4 }
  0xa5   : > { %p2882_p9 = scmp.lt.u32.totalorder %s2902_s4, %s3302_s6 }
  0xa6   : > { %p2877_p12 = pneg %p2876_p3  ;;  %p2881_p0 = por %p2880_p7, %p2879_p13 }
  0xa8   : > { %p2883_p6 = por %p2882_p9, %p2881_p0 }
  0xaa   : > { %p2884_p5 = pnand %p2883_p6, %p2877_p12 }
  0xac   : > { %2887 = shalt.err (!%p2884_p5)
}
  0xad   : > { %s2888_s20 = scalar_lea.vmem %s3304_s27, 256  ;;  %s3017_s16 = smov [#allocation6]  }
  0xae   : > { %p2889_p11 = scmp.ne.s32.totalorder %s3304_s27, %s2888_s20  ;;  %s2892_s19 = sshll.u32 %s3017_s16, 4  ;;  %s2893_s19 = int_to_ptr.vmem [resolvable:$false] %s2892_s19 }
  0xaf   : > { %s2894_s7 = scalar_lea.vmem %s2893_s19, 512  ;;  %p2895_p10 = scmp.lt.s32.totalorder %s3304_s27, %s2893_s19 }
  0xb0   : > { %p2890_p2 = pnand %p2889_p11, %p3581_p1  ;;  %p2896_p3 = scmp.lt.s32.totalorder %s2894_s7, %s2888_s20 }
  0xb2   : > { %p2891_p8 = pneg %p2890_p2  ;;  %p2897_p13 = por %p2896_p3, %p2895_p10 }
  0xb4   : > { %p2898_p7 = pnand %p2897_p13, %p2891_p8 }
  0xb6   : > { %2901 = shalt.err (!%p2898_p7)
}
  0xb7   : > { %s3018_s24 = smov 128   ;;  %s3019_s3 = smov 8  }
  0xb8   : > { %2428 = dma.hbm_to_vmem [thread:$0]  (%p3581_p1), %s3302_s6, 256, %s3304_s27, %s3306_s17, %s3018_s24, %s3018_s24, %s3019_s3  }
  0xb9 PF: > { %p3582_p12 = scmp.ne.s32.totalorder %s3576_s12, 0 }
  0xba   : > { %s3332_s9 = sand.u32 (!%p3582_p12), 1, %s2997_s28   ;;  %p3583_p0 = scmp.ne.s32.totalorder (!%p3582_p12), %s3568_s15, 0 }
  0xbb   : > { %332 = sbr.rel (%p3582_p12) target bundleno = 864 (0x360), region = 48  ;;  %s2159_s10 = sshll.u32 (!%p3582_p12), %s3332_s9, 5 }
  0xbc   : > { %s335_s4 = scalar_lea.sflag (!%p3582_p12), [#allocation4], %s3332_s9  ;;  %s3336_s18 = scalar_lea.vmem (!%p3582_p12), [#allocation3], %s2159_s10 }
  0xc2   : > { %2960 = dma.done.wait (%p3583_p0), %s335_s4, 512  }
  0xc3   : > { %2962 = vsyncadd (%p3583_p0), %s335_s4, 4294966784  ;;  %s343_s21 = sand.u32 1, %s3097_s8   ;;  %s345_s12 = sand.u32 1, %s2985_s25  }
  0xc4   : > { %s3344_s27 = sshll.u32 %s345_s12, 4  ;;  %s344_s6 = scalar_lea.sflag [#allocation7], %s343_s21 }
  0xc5   : > { %s347_s17 = scalar_lea.vmem [#allocation6], %s3344_s27  ;;  %p3584_p1 = scmp.ne.s32.totalorder %s3570_s22, 0 }
  0xc7   : > { %2964 = dma.done.wait (%p3584_p1), %s344_s6, 256  }
  0xc8   : > { %2966 = vsyncadd (%p3584_p1), %s344_s6, 4294967040  ;;  %p3585_p9 = scmp.eq.s32.totalorder %s3097_s8, 0 }
  0xca   : > { %2968 = dma.done.wait (%p3585_p9), [#allocation7], 12288   ;;  %p3586_p6 = pmov %p3585_p9 }
  0xcc   : > { %2970 = vsyncadd (%p3586_p6), [#allocation7], 4294955008  ;;  %p3587_p5 = pmov %p3586_p6 }
  0xce   : > { %2972 = dma.done.wait (%p3587_p5), [#allocation10], 8192   ;;  %p3588_p11 = pmov %p3587_p5 }
  0xcf   : > { %v2529_v0 = vld [vmem:[#allocation8 + $0x104] ss:$8 sps:$4 sm:$0xff]   ;;  %v2531_v1 = vld [vmem:[#allocation8 + $0x100] ss:$8 sps:$4 sm:$0xff]   ;;  %v2532_v2 = vld [vmem:[#allocation8 + $0x114] ss:$8 sps:$4 sm:$0xff]  }
  0xd0   : > { %2974 = vsyncadd (%p3588_p11), [#allocation10], 4294959104  ;;  %705 = vmatprep.subr.bf16.mxu0 %v2529_v0  ;;  %v2534_v3 = vld [vmem:[#allocation8 + $0x110] ss:$8 sps:$4 sm:$0xff]   ;;  %v2535_v4 = vld [vmem:[#allocation8 + $0x124] ss:$8 sps:$4 sm:$0xff]  }
  0xd1   : > { %706 = vmatpush1.bf16.msra.mxu0 %v2531_v1  ;;  %v2537_v5 = vld [vmem:[#allocation8 + $0x120] ss:$8 sps:$4 sm:$0xff]   ;;  %v2538_v6 = vld [vmem:[#allocation8 + $0x134] ss:$8 sps:$4 sm:$0xff]   ;;  %v2540_v7 = vld [vmem:[#allocation8 + $0x130] ss:$8 sps:$4 sm:$0xff]  }
  0xd2   : > { %707 = vmatprep.subr.bf16.mxu0 %v2532_v2  ;;  %v2541_v8 = vld [vmem:[#allocation8 + $0x144] ss:$8 sps:$4 sm:$0xff]   ;;  %v2543_v9 = vld [vmem:[#allocation8 + $0x140] ss:$8 sps:$4 sm:$0xff]   ;;  %v2544_v10 = vld [vmem:[#allocation8 + $0x154] ss:$8 sps:$4 sm:$0xff]  }
  0xd3   : > { %v2546_v11 = vld [vmem:[#allocation8 + $0x150] ss:$8 sps:$4 sm:$0xff]   ;;  %v2547_v12 = vld [vmem:[#allocation8 + $0x164] ss:$8 sps:$4 sm:$0xff]   ;;  %v2549_v13 = vld [vmem:[#allocation8 + $0x160] ss:$8 sps:$4 sm:$0xff]  }
  0xd4   : > { %v3360_v14 = vld [vmem:[%s3336_s18 + $0x4] ss:$8 sps:$4 sm:$0xff]   ;;  %v3363_v15 = vld [vmem:[%s3336_s18 + $0x14] ss:$8 sps:$4 sm:$0xff]   ;;  %v3367_v17 = vld [vmem:[%s3336_s18] ss:$8 sps:$4 sm:$0xff]  }
  0xd5   : > { %708 = vmatpush1.bf16.msra.mxu0 %v2534_v3  ;;  %v2550_v16 = vld [vmem:[#allocation8 + $0x174] ss:$8 sps:$4 sm:$0xff]   ;;  %434 = vst [vmem:[#allocation2 + $0x8] sm:$0xff] %v3360_v14  ;;  %v3370_v18 = vld [vmem:[%s3336_s18 + $0x10] ss:$8 sps:$4 sm:$0xff]   ;;  %433 = vst [vmem:[#allocation2] sm:$0xff] %v3367_v17 }
  0xd6   : > { %709 = vmatprep.subr.bf16.mxu0 %v2535_v4  ;;  %v2552_v19 = vld [vmem:[#allocation8 + $0x170] ss:$8 sps:$4 sm:$0xff]   ;;  %v2553_v20 = vld [vmem:[#allocation8 + $0x184] ss:$8 sps:$4 sm:$0xff]   ;;  %v535_v21 = vrot.slane %v3363_v15, 1  ;;  %vm530_vm0 = vcmask 1046528  }
  0xd7   : > { %v2555_v22 = vld [vmem:[#allocation8 + $0x180] ss:$8 sps:$4 sm:$0xff]   ;;  %v2556_v24 = vld [vmem:[#allocation8 + $0x194] ss:$8 sps:$4 sm:$0xff]   ;;  %v2558_v28 = vld [vmem:[#allocation8 + $0x190] ss:$8 sps:$4 sm:$0xff]  }
  0xd8   : > { %v2607_v27 = vld [vmem:[#allocation9 + $0xc0] sm:$0xff]   ;;  %v2562_v32 = vld [vmem:[#allocation8 + $0x1b4] ss:$8 sps:$4 sm:$0xff]   ;;  %v2612_v33 = vld [vmem:[#allocation9 + $0xc8] sm:$0xff]   ;;  %v532_v57 = vrot.slane %v3370_v18, 1  ;;  %v774_v59 = vshll.u32 %v3360_v14, 16 }
  0xd9   : > { %710 = vmatpush1.bf16.msra.mxu0 %v2537_v5  ;;  %v2559_v29 = vld [vmem:[#allocation8 + $0x1a4] ss:$8 sps:$4 sm:$0xff]   ;;  %2350 = vmatprep.subr.bf16.mxu1 %v2607_v27  ;;  %v2561_v31 = vld [vmem:[#allocation8 + $0x1a0] ss:$8 sps:$4 sm:$0xff]   ;;  %v2564_v35 = vld [vmem:[#allocation8 + $0x1b0] ss:$8 sps:$4 sm:$0xff]  }
  0xda   : > { %711 = vmatprep.subr.bf16.mxu0 %v2538_v6  ;;  %v2608_v30 = vld [vmem:[#allocation9 + $0x80] sm:$0xff]   ;;  %v2613_v34 = vld [vmem:[#allocation9 + $0x88] sm:$0xff]   ;;  %v2617_v37 = vld [vmem:[#allocation9 + $0xd0] sm:$0xff]   ;;  %vm1394_vm1 = vcmask 1045504   ;;  %vm758_vm2 = vsmask.f32 7424 }
  0xdb   : > { %2351 = vmatpush3.bf16.msra.mxu1 %v2608_v30  ;;  %v2565_v36 = vld [vmem:[#allocation8 + $0x1c4] ss:$8 sps:$4 sm:$0xff]   ;;  %v2618_v38 = vld [vmem:[#allocation9 + $0x90] sm:$0xff]   ;;  %v2567_v39 = vld [vmem:[#allocation8 + $0x1c0] ss:$8 sps:$4 sm:$0xff]   ;;  %v1399_v0 = vrot.slane %v3363_v15, 2 }
  0xdc   : > { %v3374_v23 = vld [vmem:[#allocation2 + $0x8] sm:$0xfe]  ;;  %2352 = vmatprep.subr.bf16.mxu1 %v2612_v33  ;;  %v2627_v43 = vld [vmem:[#allocation9 + $0xe0] sm:$0xff]   ;;  %v2632_v48 = vld [vmem:[#allocation9 + $0xe8] sm:$0xff]   ;;  %v772_v1 = vshrl.u32 %v3360_v14, 16  ;;  %v1396_v5 = vrot.slane %v3370_v18, 2 }
  0xdd   : > { %712 = vmatpush1.bf16.msra.mxu0 %v2540_v7  ;;  %v534_v25 = vrot.slane %v3374_v23, 1  ;;  %v2622_v40 = vld [vmem:[#allocation9 + $0xd8] sm:$0xff]   ;;  %v2628_v45 = vld [vmem:[#allocation9 + $0xa0] sm:$0xff]   ;;  %v3380_v50 = vld [vmem:[#allocation2] sm:$0xfe]  ;;  %v776_v6 = vrot.slane %v774_v59, 1 }
  0xde   : > { %713 = vmatprep.subr.bf16.mxu0 %v2541_v8  ;;  %v2623_v41 = vld [vmem:[#allocation9 + $0x98] sm:$0xff]   ;;  %v2571_v46 = vld [vmem:[#allocation8 + $0x1e4] ss:$8 sps:$4 sm:$0xff]   ;;  %v2573_v47 = vld [vmem:[#allocation8 + $0x1e0] ss:$8 sps:$4 sm:$0xff]   ;;  %v531_v56 = vrot.slane %v3380_v50, 1 }
  0xdf   : > { %v536_v26 = vsel %vm530_vm0, %v534_v25, %v535_v21  ;;  %2353 = vmatpush3.bf16.msra.mxu1 %v2613_v34  ;;  %v2568_v42 = vld [vmem:[#allocation8 + $0x1d4] ss:$8 sps:$4 sm:$0xff]   ;;  %v2570_v44 = vld [vmem:[#allocation8 + $0x1d0] ss:$8 sps:$4 sm:$0xff]   ;;  %v2633_v51 = vld [vmem:[#allocation9 + $0xa8] sm:$0xff]   ;;  %v779_v7 = vshll.u32 %v3363_v15, 16 }
  0xe0   : > { %737 = vmatprep.mubr.bf16.mxu0 %v536_v26  ;;  %2354 = vmatprep.subr.bf16.mxu1 %v2617_v37  ;;  %v2574_v49 = vld [vmem:[#allocation8 + $0x1f4] ss:$8 sps:$4 sm:$0xff]   ;;  %v2576_v53 = vld [vmem:[#allocation8 + $0x1f0] ss:$8 sps:$4 sm:$0xff]   ;;  %v2583_v54 = vld [vmem:[#allocation8 + $0x4] ss:$8 sps:$4 sm:$0xff]   ;;  %v533_v2 = vsel %vm530_vm0, %v531_v56, %v532_v57  ;;  %v777_v26 = vor.u32 %v776_v6, %v772_v1 }
  0xe1   : > { %714 = vmatpush1.bf16.msra.mxu0 %v2543_v9  ;;  %v2637_v52 = vld [vmem:[#allocation9 + $0xf0] sm:$0xff]   ;;  %v2644_v60 = vld [vmem:[#allocation9 + $0xf8] sm:$0xff]   ;;  %v2581_v61 = vld [vmem:[#allocation8] ss:$8 sps:$4 sm:$0xff]   ;;  %vm1051_vm3 = vsmask.f32 6400 }
  0xe2   : > { %715 = vmatprep.subr.bf16.mxu0 %v2544_v10  ;;  %v2639_v55 = vld [vmem:[%s347_s17 + $0x4] ss:$8 sps:$4 sm:$0xff]   ;;  %v2645_v62 = vld [vmem:[%s347_s17] ss:$8 sps:$4 sm:$0xff]   ;;  %s3589_s13 = sld [smem:[#allocation25_spill]]  ;;  %s3590_s16 = sld [smem:[#allocation26_spill]] }
  0xe3   : > { %2355 = vmatpush3.bf16.msra.mxu1 %v2618_v38  ;;  %v2638_v58 = vld [vmem:[#allocation9 + $0xb0] sm:$0xff]   ;;  %450 = vst [vmem:[#allocation2 + $0x28] sm:$0xff] %v2639_v55  ;;  %449 = vst [vmem:[#allocation2 + $0x20] sm:$0xff] %v2645_v62  ;;  %v2646_v3 = vld [vmem:[#allocation9 + $0xb8] sm:$0xff]   ;;  %s2164_s19 = sshll.u32 %s3332_s9, 6  ;;  %s2347_s3 = sshll.u32 %s3097_s8, 10 }
  0xe4   : > { %2356 = vmatprep.subr.bf16.mxu1 %v2622_v40  ;;  %v2588_v63 = vld [vmem:[#allocation8 + $0x14] ss:$8 sps:$4 sm:$0xff]   ;;  %v2650_v9 = vld [vmem:[#allocation9 + $0x40] sm:$0xff]   ;;  %v2655_v27 = vld [vmem:[#allocation9 + $0x48] sm:$0xff]   ;;  %s394_s7 = scalar_lea.vmem [#allocation12], %s2164_s19  ;;  %s3591_s10 = sld [smem:[#allocation22_spill]] }
  0xe5   : > { %716 = vmatpush1.bf16.msra.mxu0 %v2546_v11  ;;  %v1356_v4 = vld [vmem:[#allocation2 + $0x8] sm:$0xfc]  ;;  %v1355_v10 = vld [vmem:[#allocation2] sm:$0xfc]  ;;  %v2651_v25 = vld [vmem:[#allocation9] sm:$0xff]   ;;  %s2014_s24 = sshll.u32 %s394_s7, 4  ;;  %s3480_s24 = int_to_ptr.vmem [resolvable:$true] %s2014_s24 }
  0xe6   : > { %717 = vmatprep.subr.bf16.mxu0 %v2547_v12  ;;  %v1398_v8 = vrot.slane %v1356_v4, 2  ;;  %v2586_v11 = vld [vmem:[#allocation8 + $0x10] ss:$8 sps:$4 sm:$0xff]   ;;  %v2589_v30 = vld [vmem:[#allocation8 + $0x20] ss:$8 sps:$4 sm:$0xff]   ;;  %s3592_s21 = sld [smem:[#allocation27_spill]] }
  0xe7   : > { %2357 = vmatpush3.bf16.msra.mxu1 %v2623_v41  ;;  %v2656_v33 = vld [vmem:[#allocation9 + $0x8] sm:$0xff]   ;;  %v2661_v38 = vld [vmem:[#allocation9 + $0x10] sm:$0xff]   ;;  %v2685_v62 = vld [vmem:[#allocation9 + $0x78] sm:$0xff]   ;;  %s2000_s8 = scalar_lea.sflag [#allocation5], %s3332_s9  ;;  %s2903_s27 = scalar_lea.vmem %s3480_s24, 1024 }
  0xe8   : > { %2358 = vmatprep.subr.bf16.mxu1 %v2627_v43  ;;  %v1400_v12 = vsel %vm1394_vm1, %v1398_v8, %v1399_v0  ;;  %v2597_v37 = vld [vmem:[#allocation8 + $0x44] ss:$8 sps:$4 sm:$0xff]   ;;  %v2595_v40 = vld [vmem:[#allocation8 + $0x40] ss:$8 sps:$4 sm:$0xff]   ;;  %v2600_v41 = vld [vmem:[#allocation8 + $0x54] ss:$8 sps:$4 sm:$0xff]   ;;  %p2904_p2 = scmp.ne.s32.totalorder %s3480_s24, %s2903_s27 }
  0xe9   : > { %718 = vmatpush1.bf16.msra.mxu0 %v2549_v13  ;;  %v1395_v13 = vrot.slane %v1355_v10, 2  ;;  %1537 = vmatprep.mubr.bf16.mxu1 %v1400_v12  ;;  %v2670_v43 = vld [vmem:[#allocation9 + $0x60] sm:$0xff]   ;;  %v2606_v55 = vld [vmem:[#allocation8 + $0x74] ss:$8 sps:$4 sm:$0xff]   ;;  %v2676_v56 = vld [vmem:[#allocation9 + $0x28] sm:$0xff]   ;;  %s3020_s6 = smov [#allocation12]  }
  0xea   : > { %719 = vmatprep.subr.bf16.mxu0 %v2550_v16  ;;  %v2591_v16 = vld [vmem:[#allocation8 + $0x24] ss:$8 sps:$4 sm:$0xff]   ;;  %v2604_v59 = vld [vmem:[#allocation8 + $0x70] ss:$8 sps:$4 sm:$0xff]   ;;  %v2626_v4 = vld [vmem:[#allocation8 + $0xb4] ss:$8 sps:$4 sm:$0xff]  }
  0xeb   : > { %2359 = vmatpush3.bf16.msra.mxu1 %v2628_v45  ;;  %v2603_v45 = vld [vmem:[#allocation8 + $0x64] ss:$8 sps:$4 sm:$0xff]   ;;  %v2686_v1 = vld [vmem:[#allocation9 + $0x38] sm:$0xff]   ;;  %v2629_v12 = vld [vmem:[#allocation8 + $0xc0] ss:$8 sps:$4 sm:$0xff]   ;;  %p3593_p8 = scmp.ne.s32.totalorder %s3591_s10, 0 }
  0xec   : > { %2360 = vmatprep.subr.bf16.mxu1 %v2632_v48  ;;  %v2716_v6 = vld [vmem:[#allocation11 + $0x4] ss:$8 sps:$4 sm:$0xff]   ;;  %v2624_v8 = vld [vmem:[#allocation8 + $0xb0] ss:$8 sps:$4 sm:$0xff]   ;;  %s3485_s12 = scalar_lea.hbm %s3592_s21, %s2347_s3  ;;  %s2907_s17 = sshll.u32 %s3020_s6, 4  ;;  %s2908_s17 = int_to_ptr.vmem [resolvable:$false] %s2907_s17 }
  0xed   : > { %720 = vmatpush1.bf16.msra.mxu0 %v2552_v19  ;;  %v3397_v19 = vld [vmem:[#allocation2 + $0x28] sm:$0x1]  ;;  %v2631_v10 = vld [vmem:[#allocation8 + $0xc4] ss:$8 sps:$4 sm:$0xff]   ;;  %p2905_p10 = pnand %p2904_p2, %p3593_p8  ;;  %s2909_s15 = scalar_lea.vmem %s2908_s17, 2048 }
  0xee   : > { %721 = vmatprep.subr.bf16.mxu0 %v2553_v20  ;;  %v3401_v20 = vrot.slane %v779_v7, 1  ;;  %p2910_p13 = scmp.lt.s32.totalorder %s3480_s24, %s2908_s17  ;;  %p2911_p7 = scmp.lt.s32.totalorder %s2909_s15, %s2903_s27 }
  0xef   : > { %2361 = vmatpush3.bf16.msra.mxu1 %v2633_v51  ;;  %v3419_v51 = vld [vmem:[#allocation2 + $0x20] sm:$0x3]  ;;  %p2906_p3 = pneg %p2905_p10 }
  0xf0   : > { %2362 = vmatprep.subr.bf16.mxu1 %v2637_v52  ;;  %v782_v34 = vsel %vm758_vm2, %v777_v26, %v3401_v20  ;;  %v760_v26 = vshrl.u32 %v3367_v17, 16  ;;  %p2912_p12 = por %p2911_p7, %p2910_p13 }
  0xf1   : > { %722 = vmatpush1.bf16.msra.mxu0 %v2555_v22  ;;  %v539_v22 = vrot.slane %v3397_v19, 1 }
  0xf2   : > { %723 = vmatprep.subr.bf16.mxu0 %v2556_v24  ;;  %v1397_v24 = vsel %vm1394_vm1, %v1395_v13, %v1396_v5  ;;  %v2636_v13 = vld [vmem:[#allocation8 + $0xd4] ss:$8 sps:$4 sm:$0xff]   ;;  %p2913_p0 = pnand %p2912_p12, %p2906_p3 }
  0xf3   : > { %2363 = vmatpush3.bf16.msra.mxu1 %v2638_v58  ;;  %v2680_v58 = vld [vmem:[#allocation9 + $0x70] sm:$0xff]  }
  0xf4   : > { %2364 = vmatprep.subr.bf16.mxu1 %v2644_v60  ;;  %v2611_v60 = vld [vmem:[#allocation8 + $0x84] ss:$8 sps:$4 sm:$0xff]  }
  0xf5   : > { %724 = vmatpush1.bf16.msra.mxu0 %v2558_v28  ;;  %v540_v28 = vsel %vm530_vm0, %v535_v21, %v539_v22  ;;  %v2592_v21 = vld [vmem:[#allocation8 + $0x30] ss:$8 sps:$4 sm:$0xff]   ;;  %v762_v22 = vshll.u32 %v3367_v17, 16 }
  0xf6   : > { %725 = vmatprep.subr.bf16.mxu0 %v2559_v29  ;;  %v3410_v29 = vld [vmem:[#allocation2 + $0x20] sm:$0x1] }
  0xf7   : > { %2365 = vmatpush3.bf16.msra.mxu1 %v2646_v3  ;;  %v2621_v3 = vld [vmem:[#allocation8 + $0xa4] ss:$8 sps:$4 sm:$0xff]  }
  0xf8   : > { %2378 = vmatprep.subr.bf16.mxu1 %v2650_v9  ;;  %v2719_v9 = vld [vmem:[#allocation11 + $0x14] ss:$8 sps:$4 sm:$0xff]  }
  0xf9   : > { %726 = vmatpush1.bf16.msra.mxu0 %v2561_v31  ;;  %v2594_v31 = vld [vmem:[#allocation8 + $0x34] ss:$8 sps:$4 sm:$0xff]  }
  0xfa   : > { %727 = vmatprep.subr.bf16.mxu0 %v2562_v32  ;;  %1538 = vmatmul.mubr.bf16.vlgmr.msra.gmra.mrb[0].mxu1 %v1397_v24  ;;  %v537_v32 = vrot.slane %v3410_v29, 1  ;;  %v2643_v24 = vld [vmem:[#allocation8 + $0xe4] ss:$8 sps:$4 sm:$0xff]  }
  0xfb   : > { %2379 = vmatpush3.bf16.msra.mxu1 %v2651_v25  ;;  %v2641_v25 = vld [vmem:[#allocation8 + $0xe0] ss:$8 sps:$4 sm:$0xff]  }
  0xfc   : > { %2380 = vmatprep.subr.bf16.mxu1 %v2655_v27  ;;  %v764_v27 = vrot.slane %v762_v22, 1  ;;  %v2707_v22 = vld [vmem:[#allocation8 + $0x2d4] ss:$8 sps:$4 sm:$0xff]  }
  0xfd   : > { %728 = vmatpush1.bf16.msra.mxu0 %v2564_v35  ;;  %v538_v35 = vsel %vm530_vm0, %v532_v57, %v537_v32  ;;  %v795_v32 = vshll.u32 %v3397_v19, 16  ;;  %v783_v19 = vshrl.u32 %v3370_v18, 16 }
  0xfe   : > { %729 = vmatprep.subr.bf16.mxu0 %v2565_v36  ;;  %v2660_v36 = vld [vmem:[#allocation9 + $0x50] sm:$0xff]  }
  0xff   : > { %2381 = vmatpush3.bf16.msra.mxu1 %v2656_v33  ;;  %v2647_v33 = vld [vmem:[#allocation8 + $0xf0] ss:$8 sps:$4 sm:$0xff]  }
 0x100   : > { %2382 = vmatprep.subr.bf16.mxu1 %v2660_v36  ;;  %v1065_v36 = vshrl.u32 %v3374_v23, 16 }
 0x101   : > { %730 = vmatpush1.bf16.msra.mxu0 %v2567_v39  ;;  %v2665_v39 = vld [vmem:[#allocation9 + $0x58] sm:$0xff]  }
 0x102   : > { %731 = vmatprep.subr.bf16.mxu0 %v2568_v42  ;;  %v2666_v42 = vld [vmem:[#allocation9 + $0x18] sm:$0xff]  }
 0x103   : > { %2383 = vmatpush3.bf16.msra.mxu1 %v2661_v38  ;;  %v1068_v38 = vshll.u32 %v3374_v23, 16  ;;  %v2657_v23 = vld [vmem:[#allocation8 + $0x210] ss:$8 sps:$4 sm:$0xff]  }
 0x104   : > { %2384 = vmatprep.subr.bf16.mxu1 %v2665_v39  ;;  %v2652_v39 = vld [vmem:[#allocation8 + $0x200] ss:$8 sps:$4 sm:$0xff]  }
 0x105   : > { %732 = vmatpush1.bf16.msra.mxu0 %v2570_v44  ;;  %v2598_v44 = vld [vmem:[#allocation8 + $0x50] ss:$8 sps:$4 sm:$0xff]  }
 0x106   : > { %733 = vmatprep.subr.bf16.mxu0 %v2571_v46  ;;  %v3416_v46 = vld [vmem:[#allocation2 + $0x28] sm:$0x3] }
 0x107   : > { %2385 = vmatpush3.bf16.msra.mxu1 %v2666_v42  ;;  %v1403_v48 = vrot.slane %v3416_v46, 2  ;;  %v1067_v42 = vrot.slane %v1065_v36, 1 }
 0x108   : > { %2386 = vmatprep.subr.bf16.mxu1 %v2670_v43  ;;  %v2659_v43 = vld [vmem:[#allocation8 + $0x214] ss:$8 sps:$4 sm:$0xff]  }
 0x109   : > { %734 = vmatpush1.bf16.msra.mxu0 %v2573_v47  ;;  %v2671_v47 = vld [vmem:[#allocation9 + $0x20] sm:$0xff]   ;;  %v1404_v52 = vsel %vm1394_vm1, %v1399_v0, %v1403_v48  ;;  %v2616_v0 = vld [vmem:[#allocation8 + $0x94] ss:$8 sps:$4 sm:$0xff]  }
 0x10a   : > { %735 = vmatprep.subr.bf16.mxu0 %v2574_v49  ;;  %v2675_v49 = vld [vmem:[#allocation9 + $0x68] sm:$0xff]   ;;  %1545 = vmatprep.mubr.bf16.mxu1 %v1404_v52 }
 0x10b   : > { %2387 = vmatpush3.bf16.msra.mxu1 %v2671_v47 }
 0x10c   : > { %2388 = vmatprep.subr.bf16.mxu1 %v2675_v49 }
 0x10d   : > { %736 = vmatpush1.bf16.msra.mxu0 %v2576_v53  ;;  %v1401_v53 = vrot.slane %v3419_v51, 2 }
 0x10e   : > { %963 = vmatprep.subr.bf16.mxu0 %v2583_v54  ;;  %v2601_v54 = vld [vmem:[#allocation8 + $0x60] ss:$8 sps:$4 sm:$0xff]  }
 0x10f   : > { %v1402_v57 = vsel %vm1394_vm1, %v1396_v5, %v1401_v53  ;;  %2389 = vmatpush3.bf16.msra.mxu1 %v2676_v56  ;;  %v2714_v5 = vld [vmem:[#allocation11] ss:$8 sps:$4 sm:$0xff]   ;;  %v2667_v56 = vld [vmem:[#allocation8 + $0x230] ss:$8 sps:$4 sm:$0xff]  }
 0x110   : > { %738 = vmatmul.mubr.bf16.vlgmr.msra.gmra.mrb[0].mxu0 %v533_v2  ;;  %1546 = vmatmul.mubr.bf16.gmra.mrb[4].mxu1 %v1402_v57  ;;  %v2614_v2 = vld [vmem:[#allocation8 + $0x90] ss:$8 sps:$4 sm:$0xff]   ;;  %v2674_v57 = vld [vmem:[#allocation8 + $0x244] ss:$8 sps:$4 sm:$0xff]  }
 0x111   : > { %964 = vmatpush1.bf16.msra.mxu0 %v2581_v61  ;;  %747 = vmatprep.mubr.bf16.mxu0 %v540_v28  ;;  %v2681_v61 = vld [vmem:[#allocation9 + $0x30] sm:$0xff]   ;;  %v767_v28 = vshll.u32 %v3370_v18, 16 }
 0x112   : > { %965 = vmatprep.subr.bf16.mxu0 %v2588_v63  ;;  %1682 = vmatprep.mubr.bf16.mxu1 %v3360_v14  ;;  %v2609_v63 = vld [vmem:[#allocation8 + $0x80] ss:$8 sps:$4 sm:$0xff]  }
 0x113   : > { %2390 = vmatprep.subr.bf16.mxu1 %v2680_v58  ;;  %v2619_v14 = vld [vmem:[#allocation8 + $0xa0] ss:$8 sps:$4 sm:$0xff]   ;;  %v1061_v36 = vrot.slane %v767_v28, 2 }
 0x114   : > { %2391 = vmatpush3.bf16.msra.mxu1 %v2681_v61  ;;  %v2672_v58 = vld [vmem:[#allocation8 + $0x240] ss:$8 sps:$4 sm:$0xff]   ;;  %v2684_v61 = vld [vmem:[#allocation8 + $0x264] ss:$8 sps:$4 sm:$0xff]  }
 0x115   : > { %966 = vmatpush1.bf16.msra.mxu0 %v2586_v11  ;;  %2392 = vmatprep.subr.bf16.mxu1 %v2685_v62  ;;  %v2717_v11 = vld [vmem:[#allocation11 + $0x10] ss:$8 sps:$4 sm:$0xff]   ;;  %v2682_v62 = vld [vmem:[#allocation8 + $0x260] ss:$8 sps:$4 sm:$0xff]  }
 0x116   : > { %967 = vmatprep.subr.bf16.mxu0 %v2591_v16  ;;  %v2634_v16 = vld [vmem:[#allocation8 + $0xd0] ss:$8 sps:$4 sm:$0xff]  }
 0x118   : > { %748 = vmatmul.mubr.bf16.gmra.mrb[4].mxu0 %v538_v35  ;;  %2393 = vmatpush3.bf16.msra.mxu1 %v2686_v1  ;;  %v769_v35 = vrot.slane %v767_v28, 1  ;;  %v2720_v1 = vld [vmem:[#allocation11 + $0x20] ss:$8 sps:$4 sm:$0xff]  }
 0x119   : > { %968 = vmatpush1.bf16.msra.mxu0 %v2589_v30  ;;  %995 = vmatprep.mubr.bf16.mxu0 %v782_v34  ;;  %v2649_v30 = vld [vmem:[#allocation8 + $0xf4] ss:$8 sps:$4 sm:$0xff]   ;;  %v765_v34 = vor.u32 %v764_v27, %v760_v26  ;;  %v2705_v26 = vld [vmem:[#allocation8 + $0x2d0] ss:$8 sps:$4 sm:$0xff]   ;;  %v2710_v27 = vld [vmem:[#allocation8 + $0x2e4] ss:$8 sps:$4 sm:$0xff]  }
 0x11a   : > { %969 = vmatprep.subr.bf16.mxu0 %v2594_v31  ;;  %1938 = vmatprep.subr.bf16.mxu1 %v2716_v6  ;;  %v791_v31 = vshrl.u32 %v3363_v15, 16  ;;  %v785_v48 = vor.u32 %v783_v19, %v769_v35  ;;  %v2698_v6 = vld [vmem:[#allocation8 + $0x2a4] ss:$8 sps:$4 sm:$0xff]  }
 0x11b   : > { %1683 = vmatmul.mubr.bf16.vlgmr.msra.gmra.mrb[8].mxu1 %v3367_v17 }
 0x11c   : > { %1690 = vmatprep.mubr.bf16.mxu1 %v3363_v15  ;;  %1939 = vmatpush1.bf16.msra.mxu1 %v2714_v5  ;;  %v793_v17 = vor.u32 %v791_v31, %v3401_v20  ;;  %v1072_v47 = vrot.slane %v791_v31, 1  ;;  %v1073_v20 = vrot.slane %v779_v7, 2  ;;  %v2669_v15 = vld [vmem:[#allocation8 + $0x234] ss:$8 sps:$4 sm:$0xff]   ;;  %v2693_v5 = vld [vmem:[#allocation8 + $0x290] ss:$8 sps:$4 sm:$0xff]  }
 0x11d   : > { %970 = vmatpush1.bf16.msra.mxu0 %v2592_v21  ;;  %1940 = vmatprep.subr.bf16.mxu1 %v2719_v9  ;;  %v2654_v21 = vld [vmem:[#allocation8 + $0x204] ss:$8 sps:$4 sm:$0xff]   ;;  %v2701_v9 = vld [vmem:[#allocation8 + $0x2b4] ss:$8 sps:$4 sm:$0xff]   ;;  %v1089_v31 = vshll.u32 %v3416_v46, 16 }
 0x11e   : > { %971 = vmatprep.subr.bf16.mxu0 %v2597_v37  ;;  %v797_v37 = vrot.slane %v795_v32, 1  ;;  %v3450_v53 = vor.u32 %v1073_v20, %v1072_v47  ;;  %v2729_v47 = vld [vmem:[#allocation11 + $0x50] ss:$8 sps:$4 sm:$0xff]   ;;  %v2734_v20 = vld [vmem:[#allocation11 + $0x64] ss:$8 sps:$4 sm:$0xff]  }
 0x120   : > { %1941 = vmatpush1.bf16.msra.mxu1 %v2717_v11  ;;  %v2704_v11 = vld [vmem:[#allocation8 + $0x2c4] ss:$8 sps:$4 sm:$0xff]  }
 0x121   : > { %972 = vmatpush1.bf16.msra.mxu0 %v2595_v40  ;;  %v770_v40 = vsel %vm758_vm2, %v765_v34, %v769_v35  ;;  %v1060_v34 = vrot.slane %v783_v19, 1  ;;  %v2708_v35 = vld [vmem:[#allocation8 + $0x2e0] ss:$8 sps:$4 sm:$0xff]   ;;  %v2728_v19 = vld [vmem:[#allocation11 + $0x44] ss:$8 sps:$4 sm:$0xff]  }
 0x122   : > { %973 = vmatprep.subr.bf16.mxu0 %v2600_v41  ;;  %v787_v41 = vshll.u32 %v3410_v29, 16  ;;  %v2664_v29 = vld [vmem:[#allocation8 + $0x224] ss:$8 sps:$4 sm:$0xff]  }
 0x123   : > { %1691 = vmatmul.mubr.bf16.gmra.mrb[12].mxu1 %v3370_v18 }
 0x124   : > { %v789_v49 = vrot.slane %v787_v41, 1 }
 0x125   : > { %974 = vmatpush1.bf16.msra.mxu0 %v2598_v44  ;;  %v798_v44 = vsel %vm758_vm2, %v793_v17, %v797_v37  ;;  %v1091_v17 = vrot.slane %v1089_v31, 2  ;;  %v2711_v37 = vld [vmem:[#allocation8 + $0x2f0] ss:$8 sps:$4 sm:$0xff]  }
 0x126   : > { %975 = vmatprep.subr.bf16.mxu0 %v2603_v45  ;;  %v1070_v45 = vrot.slane %v1068_v38, 2 }
 0x128   : > { %v1071_v52 = vor.u32 %v1070_v45, %v1067_v42  ;;  %v2726_v42 = vld [vmem:[#allocation11 + $0x40] ss:$8 sps:$4 sm:$0xff]   ;;  %v2731_v45 = vld [vmem:[#allocation11 + $0x54] ss:$8 sps:$4 sm:$0xff]  }
 0x129   : > { %976 = vmatpush1.bf16.msra.mxu0 %v2601_v54  ;;  %v2662_v54 = vld [vmem:[#allocation8 + $0x220] ss:$8 sps:$4 sm:$0xff]  }
 0x12a   : > { %977 = vmatprep.subr.bf16.mxu0 %v2606_v55  ;;  %v790_v55 = vsel %vm758_vm2, %v785_v48, %v789_v49  ;;  %v1075_v7 = vsel %vm1051_vm3, %v1071_v52, %v3450_v53  ;;  %v2737_v48 = vld [vmem:[#allocation11 + $0x74] ss:$8 sps:$4 sm:$0xff]   ;;  %v2740_v52 = vld [vmem:[#allocation11 + $0x84] ss:$8 sps:$4 sm:$0xff]  }
 0x12d   : > { %978 = vmatpush1.bf16.msra.mxu0 %v2604_v59  ;;  %v2679_v59 = vld [vmem:[#allocation8 + $0x254] ss:$8 sps:$4 sm:$0xff]  }
 0x12e   : > { %979 = vmatprep.subr.bf16.mxu0 %v2611_v60  ;;  %v2677_v60 = vld [vmem:[#allocation8 + $0x250] ss:$8 sps:$4 sm:$0xff]  }
 0x131   : > { %980 = vmatpush1.bf16.msra.mxu0 %v2609_v63  ;;  %v2689_v63 = vld [vmem:[#allocation8 + $0x274] ss:$8 sps:$4 sm:$0xff]  }
 0x132   : > { %981 = vmatprep.subr.bf16.mxu0 %v2616_v0  ;;  %v2687_v0 = vld [vmem:[#allocation8 + $0x270] ss:$8 sps:$4 sm:$0xff]  }
 0x135   : > { %982 = vmatpush1.bf16.msra.mxu0 %v2614_v2  ;;  %v2722_v2 = vld [vmem:[#allocation11 + $0x24] ss:$8 sps:$4 sm:$0xff]  }
 0x136   : > { %983 = vmatprep.subr.bf16.mxu0 %v2621_v3  ;;  %v2692_v3 = vld [vmem:[#allocation8 + $0x284] ss:$8 sps:$4 sm:$0xff]   ;;  %1942 = vmatprep.subr.bf16.mxu1 %v2722_v2 }
 0x137   : > { %1943 = vmatpush1.bf16.msra.mxu1 %v2720_v1 }
 0x139   : > { %984 = vmatpush1.bf16.msra.mxu0 %v2619_v14  ;;  %v2690_v14 = vld [vmem:[#allocation8 + $0x280] ss:$8 sps:$4 sm:$0xff]  }
 0x13a   : > { %985 = vmatprep.subr.bf16.mxu0 %v2626_v4  ;;  %v2695_v4 = vld [vmem:[#allocation8 + $0x294] ss:$8 sps:$4 sm:$0xff]  }
 0x13d   : > { %986 = vmatpush1.bf16.msra.mxu0 %v2624_v8  ;;  %v2696_v8 = vld [vmem:[#allocation8 + $0x2a0] ss:$8 sps:$4 sm:$0xff]  }
 0x13e   : > { %987 = vmatprep.subr.bf16.mxu0 %v2631_v10  ;;  %v2699_v10 = vld [vmem:[#allocation8 + $0x2b0] ss:$8 sps:$4 sm:$0xff]  }
 0x141   : > { %988 = vmatpush1.bf16.msra.mxu0 %v2629_v12  ;;  %v2723_v12 = vld [vmem:[#allocation11 + $0x30] ss:$8 sps:$4 sm:$0xff]  }
 0x142   : > { %989 = vmatprep.subr.bf16.mxu0 %v2636_v13  ;;  %v2725_v13 = vld [vmem:[#allocation11 + $0x34] ss:$8 sps:$4 sm:$0xff]  }
 0x143   : > { %1944 = vmatprep.subr.bf16.mxu1 %v2725_v13 }
 0x144   : > { %1945 = vmatpush1.bf16.msra.mxu1 %v2723_v12 }
 0x145   : > { %990 = vmatpush1.bf16.msra.mxu0 %v2634_v16  ;;  %v2702_v16 = vld [vmem:[#allocation8 + $0x2c0] ss:$8 sps:$4 sm:$0xff]   ;;  %1946 = vmatprep.subr.bf16.mxu1 %v2728_v19 }
 0x146   : > { %991 = vmatprep.subr.bf16.mxu0 %v2643_v24  ;;  %v1053_v24 = vshrl.u32 %v3380_v50, 16 }
 0x148   : > { %v1055_v32 = vrot.slane %v1053_v24, 1  ;;  %1947 = vmatpush1.bf16.msra.mxu1 %v2726_v42 }
 0x149   : > { %992 = vmatpush1.bf16.msra.mxu0 %v2641_v25  ;;  %v1056_v25 = vshll.u32 %v3380_v50, 16  ;;  %v2713_v50 = vld [vmem:[#allocation8 + $0x2f4] ss:$8 sps:$4 sm:$0xff]   ;;  %1948 = vmatprep.subr.bf16.mxu1 %v2731_v45 }
 0x14a   : > { %993 = vmatprep.subr.bf16.mxu0 %v2649_v30  ;;  %v1086_v30 = vshrl.u32 %v3416_v46, 16  ;;  %v1077_v46 = vshrl.u32 %v3419_v51, 16 }
 0x14c   : > { %v1079_v28 = vrot.slane %v1077_v46, 1  ;;  %1949 = vmatpush1.bf16.msra.mxu1 %v2729_v47 }
 0x14d   : > { %994 = vmatpush1.bf16.msra.mxu0 %v2647_v33  ;;  %v1058_v33 = vrot.slane %v1056_v25, 2  ;;  %1950 = vmatprep.subr.bf16.mxu1 %v2734_v20 }
 0x14e   : > { %1258 = vmatprep.subr.bf16.mxu0 %v2654_v21  ;;  %v1088_v21 = vrot.slane %v1086_v30, 1 }
 0x14f   : > { %v1059_v38 = vor.u32 %v1058_v33, %v1055_v32 }
 0x150   : > { %996 = vmatmul.mubr.bf16.vlgmr.msra.gmra.mrb[0].mxu0 %v770_v40  ;;  %v1080_v40 = vshll.u32 %v3419_v51, 16  ;;  %v1092_v41 = vor.u32 %v1091_v17, %v1088_v21 }
 0x151   : > { %1259 = vmatpush1.bf16.msra.mxu0 %v2652_v39  ;;  %1005 = vmatprep.mubr.bf16.mxu0 %v798_v44  ;;  %v1062_v39 = vor.u32 %v1061_v36, %v1060_v34 }
 0x152   : > { %1260 = vmatprep.subr.bf16.mxu0 %v2659_v43  ;;  %v1082_v43 = vrot.slane %v1080_v40, 2  ;;  %v1093_v44 = vsel %vm1051_vm3, %v3450_v53, %v1092_v41  ;;  %v2738_v53 = vld [vmem:[#allocation11 + $0x80] ss:$8 sps:$4 sm:$0xff]  }
 0x153   : > { %v1063_v18 = vsel %vm1051_vm3, %v1059_v38, %v1062_v39  ;;  %v2300_v38 = vld [vmem:[%s3589_s13 + $0x1] ss:$0 sm:$0xff] }
 0x154   : > { %v1083_v51 = vor.u32 %v1082_v43, %v1079_v28 }
 0x155   : > { %1261 = vmatpush1.bf16.msra.mxu0 %v2657_v23  ;;  %v2732_v23 = vld [vmem:[#allocation11 + $0x60] ss:$8 sps:$4 sm:$0xff]  }
 0x156   : > { %1262 = vmatprep.subr.bf16.mxu0 %v2664_v29  ;;  %v1084_v49 = vsel %vm1051_vm3, %v1062_v39, %v1083_v51  ;;  %1951 = vmatpush1.bf16.msra.mxu1 %v2732_v23  ;;  %v2735_v29 = vld [vmem:[#allocation11 + $0x70] ss:$8 sps:$4 sm:$0xff]  }
 0x157   : > { %1952 = vmatprep.subr.bf16.mxu1 %v2737_v48 }
 0x158   : > { %1006 = vmatmul.mubr.bf16.gmra.mrb[4].mxu0 %v790_v55  ;;  %v2741_v55 = vld [vmem:[#allocation11 + $0x90] ss:$8 sps:$4 sm:$0xff]  }
 0x159   : > { %1263 = vmatpush1.bf16.msra.mxu0 %v2662_v54  ;;  %1290 = vmatprep.mubr.bf16.mxu0 %v1075_v7  ;;  %v2743_v54 = vld [vmem:[#allocation11 + $0x94] ss:$8 sps:$4 sm:$0xff]   ;;  %v2744_v7 = vld [vmem:[#allocation11 + $0xa0] ss:$8 sps:$4 sm:$0xff]  }
 0x15a   : > { %1264 = vmatprep.subr.bf16.mxu0 %v2669_v15  ;;  %1953 = vmatpush1.bf16.msra.mxu1 %v2735_v29  ;;  %v2746_v15 = vld [vmem:[#allocation11 + $0xa4] ss:$8 sps:$4 sm:$0xff]  }
 0x15b   : > { %1954 = vmatprep.subr.bf16.mxu1 %v2740_v52 }
 0x15d   : > { %1265 = vmatpush1.bf16.msra.mxu0 %v2667_v56  ;;  %v2749_v56 = vld [vmem:[#allocation11 + $0xb4] ss:$8 sps:$4 sm:$0xff]  }
 0x15e   : > { %1266 = vmatprep.subr.bf16.mxu0 %v2674_v57  ;;  %1955 = vmatpush1.bf16.msra.mxu1 %v2738_v53  ;;  %v2747_v57 = vld [vmem:[#allocation11 + $0xb0] ss:$8 sps:$4 sm:$0xff]  }
 0x15f   : > { %1956 = vmatprep.subr.bf16.mxu1 %v2743_v54 }
 0x161   : > { %1267 = vmatpush1.bf16.msra.mxu0 %v2672_v58  ;;  %v2752_v58 = vld [vmem:[#allocation11 + $0xc4] ss:$8 sps:$4 sm:$0xff]  }
 0x162   : > { %1268 = vmatprep.subr.bf16.mxu0 %v2679_v59  ;;  %1957 = vmatpush1.bf16.msra.mxu1 %v2741_v55  ;;  %v2750_v59 = vld [vmem:[#allocation11 + $0xc0] ss:$8 sps:$4 sm:$0xff]  }
 0x163   : > { %1958 = vmatprep.subr.bf16.mxu1 %v2746_v15 }
 0x165   : > { %1269 = vmatpush1.bf16.msra.mxu0 %v2677_v60  ;;  %v2755_v60 = vld [vmem:[#allocation11 + $0xd4] ss:$8 sps:$4 sm:$0xff]  }
 0x166   : > { %1270 = vmatprep.subr.bf16.mxu0 %v2684_v61  ;;  %1959 = vmatpush1.bf16.msra.mxu1 %v2744_v7  ;;  %v2753_v61 = vld [vmem:[#allocation11 + $0xd0] ss:$8 sps:$4 sm:$0xff]  }
 0x167   : > { %1960 = vmatprep.subr.bf16.mxu1 %v2749_v56 }
 0x169   : > { %1271 = vmatpush1.bf16.msra.mxu0 %v2682_v62  ;;  %v2758_v62 = vld [vmem:[#allocation11 + $0xe4] ss:$8 sps:$4 sm:$0xff]  }
 0x16a   : > { %1272 = vmatprep.subr.bf16.mxu0 %v2689_v63  ;;  %1961 = vmatpush1.bf16.msra.mxu1 %v2747_v57 }
 0x16b   : > { %1962 = vmatprep.subr.bf16.mxu1 %v2752_v58 }
 0x16d   : > { %1273 = vmatpush1.bf16.msra.mxu0 %v2687_v0  ;;  %v2756_v0 = vld [vmem:[#allocation11 + $0xe0] ss:$8 sps:$4 sm:$0xff]  }
 0x16e   : > { %1274 = vmatprep.subr.bf16.mxu0 %v2692_v3  ;;  %1963 = vmatpush1.bf16.msra.mxu1 %v2750_v59 }
 0x16f   : > { %1964 = vmatprep.subr.bf16.mxu1 %v2755_v60 }
 0x171   : > { %1275 = vmatpush1.bf16.msra.mxu0 %v2690_v14 }
 0x172   : > { %1276 = vmatprep.subr.bf16.mxu0 %v2695_v4  ;;  %1965 = vmatpush1.bf16.msra.mxu1 %v2753_v61  ;;  %v2761_v4 = vld [vmem:[#allocation11 + $0xf4] ss:$8 sps:$4 sm:$0xff]  }
 0x173   : > { %1966 = vmatprep.subr.bf16.mxu1 %v2758_v62 }
 0x175   : > { %1277 = vmatpush1.bf16.msra.mxu0 %v2693_v5 }
 0x176   : > { %1278 = vmatprep.subr.bf16.mxu0 %v2698_v6  ;;  %1967 = vmatpush1.bf16.msra.mxu1 %v2756_v0  ;;  %v2759_v6 = vld [vmem:[#allocation11 + $0xf0] ss:$8 sps:$4 sm:$0xff]   ;;  %v1768_v0 = vlaneseq }
 0x177   : > { %1968 = vmatprep.subr.bf16.mxu1 %v2761_v4 }
 0x179   : > { %1279 = vmatpush1.bf16.msra.mxu0 %v2696_v8 }
 0x17a   : > { %1280 = vmatprep.subr.bf16.mxu0 %v2701_v9  ;;  %1969 = vmatpush1.bf16.msra.mxu1 %v2759_v6 }
 0x17d   : > { %1281 = vmatpush1.bf16.msra.mxu0 %v2699_v10 }
 0x17e   : > { %1282 = vmatprep.subr.bf16.mxu0 %v2704_v11 }
 0x181   : > { %1283 = vmatpush1.bf16.msra.mxu0 %v2702_v16 }
 0x182   : > { %1284 = vmatprep.subr.bf16.mxu0 %v2707_v22 }
 0x185   : > { %1285 = vmatpush1.bf16.msra.mxu0 %v2705_v26 }
 0x186   : > { %1286 = vmatprep.subr.bf16.mxu0 %v2710_v27 }
 0x189   : > { %1287 = vmatpush1.bf16.msra.mxu0 %v2708_v35 }
 0x18a   : > { %1288 = vmatprep.subr.bf16.mxu0 %v2713_v50 }
 0x18d   : > { %1289 = vmatpush1.bf16.msra.mxu0 %v2711_v37  ;;  %v2299_v37 = vld [vmem:[%s3589_s13] ss:$0 sm:$0xff] }
 0x190   : > { %1291 = vmatmul.mubr.bf16.vlgmr.msra.gmra.mrb[0].mxu0 %v1063_v18 }
 0x191   : > { %1300 = vmatprep.mubr.bf16.mxu0 %v1093_v44 }
 0x198   : > { %1301 = vmatmul.mubr.bf16.gmra.mrb[4].mxu0 %v1084_v49 }
 0x1cd   : > { %v2366_v63 = vpop.f32.mrb[0].mxu1 }
 0x1ce   : > { %v2367_v1 = vpop.f32.mrb[1].mxu1 }
 0x1cf   : > { %v2368_v2 = vadd.f32 %v2367_v1, %v2366_v63  ;;  %v2369_v3 = vpop.f32.mrb[2].mxu1  ;;  %v1769_v1 = vshrl.u32 %v1768_v0, 7 }
 0x1d0   : > { %v2370_v14 = vpop.f32.mrb[3].mxu1 }
 0x1d1   : > { %v2371_v5 = vadd.f32 %v2370_v14, %v2369_v3  ;;  %v408_v3 = vld [vmem:[%s3590_s16] sm:$0x3]  ;;  %v1774_v14 = vsub.s32 1, %v1769_v1 }
 0x1e3   : > { %v2372_v8 = vpop.f32.mrb[4].mxu1 }
 0x1e4   : > { %v2373_v9 = vpop.f32.mrb[5].mxu1 }
 0x1e5   : > { %v2374_v10 = vadd.f32 %v2373_v9, %v2372_v8  ;;  %v2375_v11 = vpop.f32.mrb[6].mxu1 }
 0x1e6   : > { %v2376_v12 = vpop.f32.mrb[7].mxu1 }
 0x1e7   : > { %v2377_v13 = vadd.f32 %v2376_v12, %v2375_v11 }
 0x1ee   : > { %v2394_v16 = vpop.f32.mrb[8].mxu1 }
 0x1ef   : > { %v2395_v22 = vpop.f32.mrb[9].mxu1 }
 0x1f0   : > { %v2396_v24 = vadd.f32 %v2395_v22, %v2394_v16  ;;  %v2397_v25 = vpop.f32.mrb[10].mxu1 }
 0x1f1   : > { %v2398_v26 = vpop.f32.mrb[11].mxu1 }
 0x1f2   : > { %v1685_v27 = vadd.f32 %v2396_v24, %v2368_v2  ;;  %v2399_v30 = vadd.f32 %v2398_v26, %v2397_v25  ;;  %v1770_v2 = vsub.s32 0, %v1769_v1 }
 0x1f4   : > { %v1688_v31 = vadd.f32 %v2399_v30, %v2371_v5  ;;  %v1771_v4 = vrot.slane %v408_v3, %v1770_v2  ;;  %v1775_v5 = vrot.slane %v408_v3, %v1774_v14 }
 0x1f6   : > { %v2400_v32 = vpop.f32.mrb[12].mxu1 }
 0x1f7   : > { %v2401_v33 = vpop.f32.mrb[13].mxu1 }
 0x1f8   : > { %v2402_v34 = vadd.f32 %v2401_v33, %v2400_v32  ;;  %v2403_v35 = vpop.f32.mrb[14].mxu1 }
 0x1f9   : > { %v2404_v36 = vpop.f32.mrb[15].mxu1 }
 0x1fa   : > { %v1693_v50 = vadd.f32 %v2402_v34, %v2374_v10  ;;  %v2405_v21 = vadd.f32 %v2404_v36, %v2403_v35 }
 0x1fc   : > { %v1696_v17 = vadd.f32 %v2405_v21, %v2377_v13 }
 0x263   : > { %v1292_v39 = vpop.f32.mrb[0].mxu0 }
 0x264   : > { %v1705_v46 = vadd.f32 %v2299_v37, %v1292_v39  ;;  %v1294_v40 = vpop.f32.mrb[1].mxu0 }
 0x265   : > { %v1715_v41 = vadd.f32 %v2300_v38, %v1294_v40  ;;  %v1296_v42 = vpop.f32.mrb[2].mxu0 }
 0x266   : > { %v1706_v19 = vadd.f32 %v2299_v37, %v1296_v42  ;;  %v1298_v18 = vpop.f32.mrb[3].mxu0  ;;  %v1723_v44 = vmax.f32 %v1705_v46, 0.0 }
 0x267   : > { %v1719_v28 = vadd.f32 %v1715_v41, %v1685_v27  ;;  %v1716_v43 = vadd.f32 %v2300_v38, %v1298_v18 }
 0x268   : > { %v1724_v45 = vmax.f32 %v1706_v19, 0.0 }
 0x269   : > { %v1720_v47 = vadd.f32 %v1716_v43, %v1688_v31  ;;  %v1727_v51 = vmax.f32 %v1719_v28, 0.0 }
 0x26a   : > { %v1731_v20 = vpack.c.bf16 %v1724_v45, %v1723_v44 }
 0x26b   : > { %v1728_v23 = vmax.f32 %v1720_v47, 0.0  ;;  %v1302_v48 = vpop.f32.mrb[4].mxu0 }
 0x26c   : > { %v1707_v49 = vadd.f32 %v2299_v37, %v1302_v48  ;;  %v1304_v29 = vpop.f32.mrb[5].mxu0 }
 0x26d   : > { %v1717_v52 = vadd.f32 %v2300_v38, %v1304_v29  ;;  %v1306_v53 = vpop.f32.mrb[6].mxu0  ;;  %v1732_v54 = vpack.c.bf16 %v1728_v23, %v1727_v51 }
 0x26e   : > { %v1708_v55 = vadd.f32 %v2299_v37, %v1306_v53  ;;  %v1308_v15 = vpop.f32.mrb[7].mxu0  ;;  %v1725_v57 = vmax.f32 %v1707_v49, 0.0 }
 0x26f   : > { %v1721_v7 = vadd.f32 %v1717_v52, %v1693_v50  ;;  %v1718_v56 = vadd.f32 %v2300_v38, %v1308_v15  ;;  %1970 = vmatprep.mubr.bf16.mxu1 %v1732_v54 }
 0x270   : > { %v1726_v58 = vmax.f32 %v1708_v55, 0.0  ;;  %1971 = vmatmul.mubr.bf16.vlgmr.msra.gmra.mrb[16].mxu1 %v1731_v20 }
 0x271   : > { %v1722_v59 = vadd.f32 %v1718_v56, %v1696_v17  ;;  %v1729_v61 = vmax.f32 %v1721_v7, 0.0 }
 0x272   : > { %v1733_v60 = vpack.c.bf16 %v1726_v58, %v1725_v57 }
 0x273   : > { %v1730_v62 = vmax.f32 %v1722_v59, 0.0 }
 0x275   : > { %v1734_v63 = vpack.c.bf16 %v1730_v62, %v1729_v61 }
 0x277   : > { %1980 = vmatprep.mubr.bf16.mxu1 %v1734_v63 }
 0x278   : > { %1981 = vmatmul.mubr.bf16.gmra.mrb[20].mxu1 %v1733_v60 }
 0x343   : > { %v1972_v6 = vpop.f32.mrb[16].mxu1 }
 0x344   : > { %v1973_v8 = vadd.f32 %v1972_v6, %v1771_v4  ;;  %v1974_v9 = vpop.f32.mrb[17].mxu1 }
 0x345   : > { %v1975_v10 = vadd.f32 %v1974_v9, %v1775_v5  ;;  %v1976_v11 = vpop.f32.mrb[18].mxu1 }
 0x346   : > { %1991 = vst [vmem:[%s394_s7] sm:$0xff] %v1973_v8  ;;  %v1977_v12 = vadd.f32 %v1976_v11, %v1771_v4  ;;  %v1978_v13 = vpop.f32.mrb[19].mxu1 }
 0x347   : > { %1992 = vst [vmem:[%s394_s7 + $0x8] sm:$0xff] %v1975_v10  ;;  %v1979_v16 = vadd.f32 %v1978_v13, %v1775_v5 }
 0x348   : > { %1993 = vst [vmem:[%s394_s7 + $0x10] sm:$0xff] %v1977_v12 }
 0x349   : > { %1994 = vst [vmem:[%s394_s7 + $0x18] sm:$0xff] %v1979_v16 }
 0x34b   : > { %v1982_v22 = vpop.f32.mrb[20].mxu1 }
 0x34c   : > { %v1983_v24 = vadd.f32 %v1982_v22, %v1771_v4  ;;  %v1984_v25 = vpop.f32.mrb[21].mxu1 }
 0x34d   : > { %v1985_v26 = vadd.f32 %v1984_v25, %v1775_v5  ;;  %v1986_v27 = vpop.f32.mrb[22].mxu1 }
 0x34e   : > { %1995 = vst [vmem:[%s394_s7 + $0x20] sm:$0xff] %v1983_v24  ;;  %v1987_v30 = vadd.f32 %v1986_v27, %v1771_v4  ;;  %v1988_v31 = vpop.f32.mrb[23].mxu1 }
 0x34f   : > { %1996 = vst [vmem:[%s394_s7 + $0x28] sm:$0xff] %v1985_v26  ;;  %v1989_v32 = vadd.f32 %v1988_v31, %v1775_v5 }
 0x350   : > { %1997 = vst [vmem:[%s394_s7 + $0x30] sm:$0xff] %v1987_v30 }
 0x351   : > { %1998 = vst [vmem:[%s394_s7 + $0x38] sm:$0xff] %v1989_v32 }
 0x352   : > { %2916 = shalt.err (!%p2913_p0)
}
 0x353   : > { %s2917_s22 = scalar_lea.hbm %s3485_s12, 1024  ;;  %s2921_s23 = scalar_lea.hbm %s3592_s21, 2048 }
 0x354   : > { %p2918_p1 = scmp.ne.s32.totalorder %s3485_s12, %s2917_s22  ;;  %p2922_p5 = scmp.lt.u32.totalorder %s3485_s12, %s3592_s21 }
 0x355   : > { %p2923_p11 = scmp.lt.u32.totalorder %s2921_s23, %s2917_s22  ;;  %p2925_p10 = scmp.lt.u32.totalorder %s2917_s22, %s3485_s12 }
 0x356   : > { %p2919_p9 = pnand %p2918_p1, %p3593_p8 }
 0x357   : > { %p2924_p2 = por %p2923_p11, %p2922_p5 }
 0x358   : > { %p2920_p6 = pneg %p2919_p9 }
 0x359   : > { %p2926_p3 = por %p2925_p10, %p2924_p2 }
 0x35b   : > { %p2927_p13 = pnand %p2926_p3, %p2920_p6 }
 0x35d   : > { %2930 = shalt.err (!%p2927_p13)
}
 0x35e   : > { %s3021_s19 = smov 256   ;;  %s3022_s7 = smov 16  }
 0x35f   : > { %2437 = dma.vmem_to_hbm [thread:$0]  (%p3593_p8), %s3480_s24, 1024, %s3485_s12, %s2000_s8, %s3021_s19, %s3021_s19, %s3022_s7  }
 0x360 PF: > { %s3594_s3 = sld [smem:[#allocation18_spill]]  ;;  %s3595_s4 = sld [smem:[#allocation23_spill]] }
 0x366   : > { %s2029_s18 = sand.u32 1, %s3594_s3   ;;  %p3596_p7 = scmp.ne.s32.totalorder %s3595_s4, 0 }
 0x367   : > { %s2030_s27 = scalar_lea.sflag [#allocation5], %s2029_s18 }
 0x368   : > { %p2450_p12 = pnand %p2146_p4, %p3596_p7 }
 0x36a   : > { %2976 = dma.done.wait (!%p2450_p12), %s2030_s27, 1024  }
 0x36b   : > { %2978 = vsyncadd (!%p2450_p12), %s2030_s27, 4294966272  ;;  %s3597_s30 = sld [smem:[#allocation19_spill]]  ;;  %s3598_s6 = sld [smem:[#allocation21_spill]] }
 0x36c   : > { %s3599_s10 = sld [smem:[#allocation20_spill]]  ;;  %s3600_s24 = smov %s2985_s25 }
 0x36d   : > { %s3601_s25 = smov %s2989_s26  ;;  %s3603_s27 = smov %s2997_s28 }
 0x36e   : > { %s3604_s28 = smov %s3001_s29 }
 0x371   : > { %p24_p8 = scmp.ge.s32.totalorder %s3597_s30, 4   ;;  %s3602_s26 = smov %s3598_s6 }
 0x372   : > { %s3605_s29 = smov %s3599_s10 }
 0x373   :  { %26 = sbr.rel (!%p24_p8) target bundleno = 15 (0xf), region = 121 }
 0x37a   :  { %2035 = vsyncpa [#allocation4], 1 }
 0x37b   :  { %2037 = vsyncpa [#allocation4 + $0x1], 1 }
 0x37c   :  { %2038 = vsyncpa [#allocation7], 1 }
 0x37d   :  { %2040 = vsyncpa [#allocation7 + $0x1], 1 }
 0x37e   :  { %2041 = vsyncpa [#allocation10], 1 }
 0x37f   :  { %2042 = vsyncpa [#allocation5], 1 }
 0x380   :  { %2044 = vsyncpa [#allocation5 + $0x1], 1 }

</bundles_post_ra>
